<compile_context>
chip_gen: v6e
topology: v6e:2x2x1
jax: 0.10.0
libtpu: 0.0.40
codegen_flags: <defaults>
</compile_context>

<pallas_src>
import functools

import jax
import jax.numpy as jnp
from jax import lax
from jax.experimental import pallas as pl
from jax.experimental.pallas import tpu as pltpu

# Synthetic encoder hyperparameters (real config unavailable).
D = 128       # hidden size == lane width -> lane-dense activations & stores
V = 48        # vocab size
H = 2         # attention heads
DH = D // H   # head dim (64)
FF = 256      # FFN hidden size
K = 3         # conv prenet kernel size

# Row layout of the packed per-channel vector table (biases + LayerNorm params).
_ROW_C1B, _ROW_C2B = 0, 1
_ROW_LN0G, _ROW_LN0B = 2, 3
_ROW_BQKV = 4
_ROW_BO = 5
_ROW_LN1G, _ROW_LN1B = 6, 7
_ROW_FF1B = 8
_ROW_FF2B = 9
_ROW_LN2G, _ROW_LN2B = 10, 11
_VEC_ROWS = 16            # padded to a multiple of 8 sublanes
_VEC_COLS = 3 * D         # widest packed vector (fused QKV bias)


def _layernorm(x, g, b):
    mu = jnp.mean(x, axis=-1, keepdims=True)
    var = jnp.mean(jnp.square(x - mu), axis=-1, keepdims=True)
    return (x - mu) * lax.rsqrt(var + 1e-5) * g + b


# --------------------- fused per-sequence Pallas kernel -------------------- #

def _encoder_kernel(h_ref, vec_ref,
                    conv1_w_ref, conv2_w_ref,
                    wqkv_ref, wo_ref,
                    ff1_w_ref, ff2_w_ref,
                    o_ref, *, S):
    f32 = jnp.float32
    bf16 = jnp.bfloat16

    vec = vec_ref[...]                                   # (16, 3D) f32

    def vrow(r, w):                                      # packed bias/LN row
        return vec[r:r + 1, :w]                          # (1, w)

    x = h_ref[...].astype(f32)                           # (S, D)
    row = lax.broadcasted_iota(jnp.int32, (S, D), 0)     # sequence position

    def conv_relu(x, w_ref_, b):
        # Conv1d(D, D, k=3, padding='same') as ONE (S, 3D) x (3D, D) matmul.
        # Neighbour rows via XLU sublane rolls + sequence-boundary mask.
        x_prev = jnp.where(row == 0, 0.0, pltpu.roll(x, shift=1, axis=0))
        x_next = jnp.where(row == S - 1, 0.0, pltpu.roll(x, shift=S - 1, axis=0))
        taps = jnp.concatenate([x_prev, x, x_next], axis=1).astype(bf16)
        y = jnp.dot(taps, w_ref_[...], preferred_element_type=f32) + b
        return jnp.maximum(y, 0.0)

    # conv prenet (2 layers)
    h = conv_relu(x, conv1_w_ref, vrow(_ROW_C1B, D))
    h = conv_relu(h, conv2_w_ref, vrow(_ROW_C2B, D))

    h2 = _layernorm(h, vrow(_ROW_LN0G, D), vrow(_ROW_LN0B, D))

    # Fused QKV projection (1/sqrt(DH) already folded into the Q columns).
    qkv = jnp.dot(h2.astype(bf16), wqkv_ref[...],
                  preferred_element_type=f32) + vrow(_ROW_BQKV, 3 * D)

    # Head-major (H, S, DH) views via aligned lane slices stacked on a leading
    # axis; every matmul below is a single batched einsum (no per-head matmuls).
    def heads(base):
        return jnp.stack(
            [qkv[:, base + i * DH: base + (i + 1) * DH] for i in range(H)],
            axis=0).astype(bf16)                          # (H, S, DH)

    q, k, v = heads(0), heads(D), heads(2 * D)

    s = jnp.einsum('hqd,hkd->hqk', q, k, preferred_element_type=f32)  # (H,S,S)
    s = s - jnp.max(s, axis=-1, keepdims=True)
    p = jnp.exp(s)
    p = p * pl.reciprocal(jnp.sum(p, axis=-1, keepdims=True), approx=True)
    ctx = jnp.einsum('hqk,hkd->hqd', p.astype(bf16), v,
                     preferred_element_type=f32)          # (H, S, DH)

    # Output projection: per-head Wo slabs contracted in one batched einsum,
    # heads reduced with a leading-axis sum (no lane-merging reshape needed).
    attn = jnp.sum(
        jnp.einsum('hqd,hdo->hqo', ctx.astype(bf16), wo_ref[...],
                   preferred_element_type=f32),
        axis=0) + vrow(_ROW_BO, D)                        # (S, D)

    # TODO(synk): residual / pre-vs-post-LN structure and padding masks of the
    # real acoustic_model.InferenceEncoder are not available; post-LN, no mask.
    h3 = _layernorm(h2 + attn, vrow(_ROW_LN1G, D), vrow(_ROW_LN1B, D))

    # FFN
    ff = jnp.maximum(
        jnp.dot(h3.astype(bf16), ff1_w_ref[...],
                preferred_element_type=f32) + vrow(_ROW_FF1B, FF), 0.0)
    ff = jnp.dot(ff.astype(bf16), ff2_w_ref[...],
                 preferred_element_type=f32) + vrow(_ROW_FF2B, D)

    out = _layernorm(h3 + ff, vrow(_ROW_LN2G, D), vrow(_ROW_LN2B, D))
    # (S, D) rows are exactly 128 lanes wide -> unmasked, lane-dense stores.
    o_ref[...] = out.astype(o_ref.dtype)


# ----------------------------- glue ---------------------------------------- #

def init_params(key):
    ks = jax.random.split(key, 10)

    def w(k, shape, scale=0.05):
        return (jax.random.normal(k, shape, jnp.float32) * scale).astype(jnp.bfloat16)

    # fused QKV weight (D, 3D); softmax scale folded into Q columns at init
    wq = jax.random.normal(ks[3], (D, D), jnp.float32) * (0.05 * DH ** -0.5)
    wk = jax.random.normal(ks[4], (D, D), jnp.float32) * 0.05
    wv = jax.random.normal(ks[5], (D, D), jnp.float32) * 0.05
    wqkv = jnp.concatenate([wq, wk, wv], axis=1).astype(jnp.bfloat16)

    # packed biases / LayerNorm params (all biases zero, gammas one)
    vec = jnp.zeros((_VEC_ROWS, _VEC_COLS), jnp.float32)
    for r in (_ROW_LN0G, _ROW_LN1G, _ROW_LN2G):
        vec = vec.at[r, :D].set(1.0)

    return {
        'embed': jax.random.normal(ks[0], (V, D), jnp.float32) * 0.1,
        # conv weights stacked over taps: rows [0:D]=prev, [D:2D]=center, [2D:3D]=next
        'conv1_w': w(ks[1], (K * D, D)),
        'conv2_w': w(ks[2], (K * D, D)),
        'wqkv': wqkv,
        'wo': w(ks[6], (H, DH, D)),        # per-head output-projection slabs
        'ff1_w': w(ks[7], (D, FF)),
        'ff2_w': w(ks[8], (FF, D)),
        'vec': vec,
    }


def _rep_spec(shape):
    # weight / table operand: identical block at every grid point (fetched once)
    return pl.BlockSpec(shape, lambda b: (0,) * len(shape))


def inference_encoder(params, x, template=None):
    """x: (B, S) int32 token ids -> (B, S, D) float32 encoder states."""
    B, S = x.shape
    h = params['embed'][x]                       # embedding gather (JAX glue)
    if template is not None:
        # TODO(synk): exact template conditioning of acoustic_model.InferenceEncoder
        # is not available; additive conditioning used as a placeholder.
        h = h + template

    weights = (params['vec'], params['conv1_w'], params['conv2_w'],
               params['wqkv'], params['wo'], params['ff1_w'], params['ff2_w'])

    return pl.pallas_call(
        functools.partial(_encoder_kernel, S=S),
        out_shape=jax.ShapeDtypeStruct((B, S, D), jnp.float32),
        grid=(B,),
        in_specs=[pl.BlockSpec((None, S, D), lambda b: (b, 0, 0))]
                 + [_rep_spec(w_.shape) for w_ in weights],
        out_specs=pl.BlockSpec((None, S, D), lambda b: (b, 0, 0)),
        compiler_params=pltpu.CompilerParams(
            dimension_semantics=("parallel",),          # batch -> both v7x TCs
            vmem_limit_bytes=32 * 1024 * 1024),         # explicit, with headroom
    )(h, *weights)


if __name__ == "__main__":
    key = jax.random.PRNGKey(0)
    pkey, xkey = jax.random.split(key)
    params = init_params(pkey)

    B, S = 2, 8
    x = jax.random.randint(xkey, (B, S), 0, V, dtype=jnp.int32)

    out = inference_encoder(params, x, template=None)
    out = jax.block_until_ready(out)
    assert out.shape == (B, S, D) and out.dtype == jnp.float32
    assert bool(jnp.all(jnp.isfinite(out)))
    print("KERNEL_OK")
</pallas_src>

<mosaic_0001>
module attributes {stable_mosaic.version = 11 : i64} {
  func.func @_encoder_kernel(%arg0: i32, %arg1: memref<1x8x128xf32, #tpu.memory_space<vmem>>, %arg2: memref<16x384xf32, #tpu.memory_space<vmem>>, %arg3: memref<384x128xbf16, #tpu.memory_space<vmem>>, %arg4: memref<384x128xbf16, #tpu.memory_space<vmem>>, %arg5: memref<128x384xbf16, #tpu.memory_space<vmem>>, %arg6: memref<2x64x128xbf16, #tpu.memory_space<vmem>>, %arg7: memref<128x256xbf16, #tpu.memory_space<vmem>>, %arg8: memref<256x128xbf16, #tpu.memory_space<vmem>>, %arg9: memref<1x8x128xf32, #tpu.memory_space<vmem>>) attributes {dimension_semantics = [#tpu.dimension_semantics<parallel>], iteration_bounds = array<i64: 2>, scalar_prefetch = 0 : i64, scratch_operands = 0 : i64, tpu.core_type = #tpu.core_type<tc>, window_params = [{transform_indices = @transform_0, window_bounds = array<i64: 1, 8, 128>}, {pipeline_mode = #tpu.pipeline_mode<synchronous>, transform_indices = @transform_1, window_bounds = array<i64: 16, 384>}, {pipeline_mode = #tpu.pipeline_mode<synchronous>, transform_indices = @transform_2, window_bounds = array<i64: 384, 128>}, {pipeline_mode = #tpu.pipeline_mode<synchronous>, transform_indices = @transform_3, window_bounds = array<i64: 384, 128>}, {pipeline_mode = #tpu.pipeline_mode<synchronous>, transform_indices = @transform_4, window_bounds = array<i64: 128, 384>}, {pipeline_mode = #tpu.pipeline_mode<synchronous>, transform_indices = @transform_5, window_bounds = array<i64: 2, 64, 128>}, {pipeline_mode = #tpu.pipeline_mode<synchronous>, transform_indices = @transform_6, window_bounds = array<i64: 128, 256>}, {pipeline_mode = #tpu.pipeline_mode<synchronous>, transform_indices = @transform_7, window_bounds = array<i64: 256, 128>}, {transform_indices = @transform_8, window_bounds = array<i64: 1, 8, 128>}]} {
    %c0 = arith.constant 0 : index
    %c0_0 = arith.constant 0 : index
    %0 = vector.load %arg2[%c0, %c0_0] : memref<16x384xf32, #tpu.memory_space<vmem>>, vector<16x384xf32>
    %c0_1 = arith.constant 0 : index
    %c0_2 = arith.constant 0 : index
    %c0_3 = arith.constant 0 : index
    %1 = vector.load %arg1[%c0_1, %c0_2, %c0_3] : memref<1x8x128xf32, #tpu.memory_space<vmem>>, vector<1x8x128xf32>
    %2 = vector.shape_cast %1 : vector<1x8x128xf32> to vector<8x128xf32>
    %3 = tpu.iota {dimensions = array<i32: 0>} : vector<8x128xi32>
    %4 = vector.extract_strided_slice %0 {offsets = [0, 0], sizes = [1, 128], strides = [1, 1]} : vector<16x384xf32> to vector<1x128xf32>
    %c0_i32 = arith.constant 0 : i32
    %5 = vector.broadcast %c0_i32 : i32 to vector<8x128xi32>
    %6 = arith.cmpi eq, %3, %5 : vector<8x128xi32>
    %c1_i32 = arith.constant 1 : i32
    %7 = tpu.dynamic_rotate %2 by %c1_i32 dim 0 : vector<8x128xf32>, i32 -> vector<8x128xf32>
    %cst = arith.constant 0.000000e+00 : f32
    %8 = vector.broadcast %cst : f32 to vector<8x128xf32>
    %9 = arith.select %6, %8, %7 : vector<8x128xi1>, vector<8x128xf32>
    %c7_i32 = arith.constant 7 : i32
    %10 = vector.broadcast %c7_i32 : i32 to vector<8x128xi32>
    %11 = arith.cmpi eq, %3, %10 : vector<8x128xi32>
    %c7_i32_4 = arith.constant 7 : i32
    %12 = tpu.dynamic_rotate %2 by %c7_i32_4 dim 0 : vector<8x128xf32>, i32 -> vector<8x128xf32>
    %cst_5 = arith.constant 0.000000e+00 : f32
    %13 = vector.broadcast %cst_5 : f32 to vector<8x128xf32>
    %14 = arith.select %11, %13, %12 : vector<8x128xi1>, vector<8x128xf32>
    %15 = tpu.concatenate %9, %2, %14 in 1 : vector<8x128xf32>, vector<8x128xf32>, vector<8x128xf32> -> vector<8x384xf32>
    %16 = arith.truncf %15 : vector<8x384xf32> to vector<8x384xbf16>
    %c0_6 = arith.constant 0 : index
    %c0_7 = arith.constant 0 : index
    %17 = vector.load %arg3[%c0_6, %c0_7] : memref<384x128xbf16, #tpu.memory_space<vmem>>, vector<384x128xbf16>
    %cst_8 = arith.constant dense<0.000000e+00> : vector<8x128xf32>
    %18 = tpu.matmul %16, %17, %cst_8 {dimension_numbers = #tpu.dot_dimension_numbers<[1], [0], [0], [1], [0, 0, 1, 1], [], []>} : vector<8x384xbf16>, vector<384x128xbf16>, vector<8x128xf32> -> vector<8x128xf32>
    %19 = vector.broadcast %4 : vector<1x128xf32> to vector<8x128xf32>
    %20 = arith.addf %18, %19 : vector<8x128xf32>
    %cst_9 = arith.constant 0.000000e+00 : f32
    %21 = vector.broadcast %cst_9 : f32 to vector<8x128xf32>
    %22 = arith.maximumf %20, %21 : vector<8x128xf32>
    %23 = vector.extract_strided_slice %0 {offsets = [1, 0], sizes = [1, 128], strides = [1, 1]} : vector<16x384xf32> to vector<1x128xf32>
    %c0_i32_10 = arith.constant 0 : i32
    %24 = vector.broadcast %c0_i32_10 : i32 to vector<8x128xi32>
    %25 = arith.cmpi eq, %3, %24 : vector<8x128xi32>
    %c1_i32_11 = arith.constant 1 : i32
    %26 = tpu.dynamic_rotate %22 by %c1_i32_11 dim 0 : vector<8x128xf32>, i32 -> vector<8x128xf32>
    %cst_12 = arith.constant 0.000000e+00 : f32
    %27 = vector.broadcast %cst_12 : f32 to vector<8x128xf32>
    %28 = arith.select %25, %27, %26 : vector<8x128xi1>, vector<8x128xf32>
    %c7_i32_13 = arith.constant 7 : i32
    %29 = vector.broadcast %c7_i32_13 : i32 to vector<8x128xi32>
    %30 = arith.cmpi eq, %3, %29 : vector<8x128xi32>
    %c7_i32_14 = arith.constant 7 : i32
    %31 = tpu.dynamic_rotate %22 by %c7_i32_14 dim 0 : vector<8x128xf32>, i32 -> vector<8x128xf32>
    %cst_15 = arith.constant 0.000000e+00 : f32
    %32 = vector.broadcast %cst_15 : f32 to vector<8x128xf32>
    %33 = arith.select %30, %32, %31 : vector<8x128xi1>, vector<8x128xf32>
    %34 = tpu.concatenate %28, %22, %33 in 1 : vector<8x128xf32>, vector<8x128xf32>, vector<8x128xf32> -> vector<8x384xf32>
    %35 = arith.truncf %34 : vector<8x384xf32> to vector<8x384xbf16>
    %c0_16 = arith.constant 0 : index
    %c0_17 = arith.constant 0 : index
    %36 = vector.load %arg4[%c0_16, %c0_17] : memref<384x128xbf16, #tpu.memory_space<vmem>>, vector<384x128xbf16>
    %cst_18 = arith.constant dense<0.000000e+00> : vector<8x128xf32>
    %37 = tpu.matmul %35, %36, %cst_18 {dimension_numbers = #tpu.dot_dimension_numbers<[1], [0], [0], [1], [0, 0, 1, 1], [], []>} : vector<8x384xbf16>, vector<384x128xbf16>, vector<8x128xf32> -> vector<8x128xf32>
    %38 = vector.broadcast %23 : vector<1x128xf32> to vector<8x128xf32>
    %39 = arith.addf %37, %38 : vector<8x128xf32>
    %cst_19 = arith.constant 0.000000e+00 : f32
    %40 = vector.broadcast %cst_19 : f32 to vector<8x128xf32>
    %41 = arith.maximumf %39, %40 : vector<8x128xf32>
    %42 = vector.extract_strided_slice %0 {offsets = [2, 0], sizes = [1, 128], strides = [1, 1]} : vector<16x384xf32> to vector<1x128xf32>
    %43 = vector.extract_strided_slice %0 {offsets = [3, 0], sizes = [1, 128], strides = [1, 1]} : vector<16x384xf32> to vector<1x128xf32>
    %cst_20 = arith.constant dense<0.000000e+00> : vector<8xf32>
    %44 = vector.multi_reduction <add>, %41, %cst_20 [1] : vector<8x128xf32> to vector<8xf32>
    %45 = vector.shape_cast %44 : vector<8xf32> to vector<8x1xf32>
    %cst_21 = arith.constant 1.280000e+02 : f32
    %46 = vector.broadcast %cst_21 : f32 to vector<8x1xf32>
    %47 = arith.divf %45, %46 : vector<8x1xf32>
    %48 = vector.broadcast %47 : vector<8x1xf32> to vector<8x128xf32>
    %49 = arith.subf %41, %48 : vector<8x128xf32>
    %50 = arith.mulf %49, %49 : vector<8x128xf32>
    %cst_22 = arith.constant dense<0.000000e+00> : vector<8xf32>
    %51 = vector.multi_reduction <add>, %50, %cst_22 [1] : vector<8x128xf32> to vector<8xf32>
    %52 = vector.shape_cast %51 : vector<8xf32> to vector<8x1xf32>
    %cst_23 = arith.constant 1.280000e+02 : f32
    %53 = vector.broadcast %cst_23 : f32 to vector<8x1xf32>
    %54 = arith.divf %52, %53 : vector<8x1xf32>
    %55 = vector.broadcast %47 : vector<8x1xf32> to vector<8x128xf32>
    %56 = arith.subf %41, %55 : vector<8x128xf32>
    %cst_24 = arith.constant 9.99999974E-6 : f32
    %57 = vector.broadcast %cst_24 : f32 to vector<8x1xf32>
    %58 = arith.addf %54, %57 : vector<8x1xf32>
    %59 = math.rsqrt %58 : vector<8x1xf32>
    %60 = vector.broadcast %59 : vector<8x1xf32> to vector<8x128xf32>
    %61 = arith.mulf %56, %60 : vector<8x128xf32>
    %62 = vector.broadcast %42 : vector<1x128xf32> to vector<8x128xf32>
    %63 = arith.mulf %61, %62 : vector<8x128xf32>
    %64 = vector.broadcast %43 : vector<1x128xf32> to vector<8x128xf32>
    %65 = arith.addf %63, %64 : vector<8x128xf32>
    %66 = arith.truncf %65 : vector<8x128xf32> to vector<8x128xbf16>
    %c0_25 = arith.constant 0 : index
    %c0_26 = arith.constant 0 : index
    %67 = vector.load %arg5[%c0_25, %c0_26] : memref<128x384xbf16, #tpu.memory_space<vmem>>, vector<128x384xbf16>
    %cst_27 = arith.constant dense<0.000000e+00> : vector<8x384xf32>
    %68 = tpu.matmul %66, %67, %cst_27 {dimension_numbers = #tpu.dot_dimension_numbers<[1], [0], [0], [1], [0, 0, 1, 1], [], []>} : vector<8x128xbf16>, vector<128x384xbf16>, vector<8x384xf32> -> vector<8x384xf32>
    %69 = vector.extract_strided_slice %0 {offsets = [4, 0], sizes = [1, 384], strides = [1, 1]} : vector<16x384xf32> to vector<1x384xf32>
    %70 = vector.broadcast %69 : vector<1x384xf32> to vector<8x384xf32>
    %71 = arith.addf %68, %70 : vector<8x384xf32>
    %72 = vector.extract_strided_slice %71 {offsets = [0, 0], sizes = [8, 64], strides = [1, 1]} : vector<8x384xf32> to vector<8x64xf32>
    %73 = vector.extract_strided_slice %71 {offsets = [0, 64], sizes = [8, 64], strides = [1, 1]} : vector<8x384xf32> to vector<8x64xf32>
    %74 = vector.shape_cast %72 : vector<8x64xf32> to vector<1x8x64xf32>
    %75 = vector.shape_cast %73 : vector<8x64xf32> to vector<1x8x64xf32>
    %76 = tpu.concatenate %74, %75 in 0 : vector<1x8x64xf32>, vector<1x8x64xf32> -> vector<2x8x64xf32>
    %77 = arith.truncf %76 : vector<2x8x64xf32> to vector<2x8x64xbf16>
    %78 = vector.extract_strided_slice %71 {offsets = [0, 128], sizes = [8, 64], strides = [1, 1]} : vector<8x384xf32> to vector<8x64xf32>
    %79 = vector.extract_strided_slice %71 {offsets = [0, 192], sizes = [8, 64], strides = [1, 1]} : vector<8x384xf32> to vector<8x64xf32>
    %80 = vector.shape_cast %78 : vector<8x64xf32> to vector<1x8x64xf32>
    %81 = vector.shape_cast %79 : vector<8x64xf32> to vector<1x8x64xf32>
    %82 = tpu.concatenate %80, %81 in 0 : vector<1x8x64xf32>, vector<1x8x64xf32> -> vector<2x8x64xf32>
    %83 = arith.truncf %82 : vector<2x8x64xf32> to vector<2x8x64xbf16>
    %84 = vector.extract_strided_slice %71 {offsets = [0, 256], sizes = [8, 64], strides = [1, 1]} : vector<8x384xf32> to vector<8x64xf32>
    %85 = vector.extract_strided_slice %71 {offsets = [0, 320], sizes = [8, 64], strides = [1, 1]} : vector<8x384xf32> to vector<8x64xf32>
    %86 = vector.shape_cast %84 : vector<8x64xf32> to vector<1x8x64xf32>
    %87 = vector.shape_cast %85 : vector<8x64xf32> to vector<1x8x64xf32>
    %88 = tpu.concatenate %86, %87 in 0 : vector<1x8x64xf32>, vector<1x8x64xf32> -> vector<2x8x64xf32>
    %89 = arith.truncf %88 : vector<2x8x64xf32> to vector<2x8x64xbf16>
    "tpu.trace_start"() <{level = 10 : i32, message = "hqd,hkd->hqk"}> : () -> ()
    %cst_28 = arith.constant dense<0.000000e+00> : vector<2x8x8xf32>
    %90 = tpu.matmul %77, %83, %cst_28 {dimension_numbers = #tpu.dot_dimension_numbers<[2], [2], [1], [1], [0, 0, 0, 1, 1, 1], [0], [0]>} : vector<2x8x64xbf16>, vector<2x8x64xbf16>, vector<2x8x8xf32> -> vector<2x8x8xf32>
    "tpu.trace_stop"() : () -> ()
    %cst_29 = arith.constant dense<0xFF800000> : vector<2x8xf32>
    %91 = vector.multi_reduction <maximumf>, %90, %cst_29 [2] : vector<2x8x8xf32> to vector<2x8xf32>
    %92 = vector.shape_cast %91 : vector<2x8xf32> to vector<2x8x1xf32>
    %93 = vector.broadcast %92 : vector<2x8x1xf32> to vector<2x8x8xf32>
    %94 = arith.subf %90, %93 : vector<2x8x8xf32>
    %95 = math.exp %94 : vector<2x8x8xf32>
    %cst_30 = arith.constant dense<0.000000e+00> : vector<2x8xf32>
    %96 = vector.multi_reduction <add>, %95, %cst_30 [2] : vector<2x8x8xf32> to vector<2x8xf32>
    %97 = vector.shape_cast %96 : vector<2x8xf32> to vector<2x8x1xf32>
    %98 = tpu.reciprocal %97 {approx = true} : vector<2x8x1xf32> -> vector<2x8x1xf32>
    %99 = vector.broadcast %98 : vector<2x8x1xf32> to vector<2x8x8xf32>
    %100 = arith.mulf %95, %99 : vector<2x8x8xf32>
    %101 = arith.truncf %100 : vector<2x8x8xf32> to vector<2x8x8xbf16>
    "tpu.trace_start"() <{level = 10 : i32, message = "hqk,hkd->hqd"}> : () -> ()
    %cst_31 = arith.constant dense<0.000000e+00> : vector<2x8x64xf32>
    %102 = tpu.matmul %101, %89, %cst_31 {dimension_numbers = #tpu.dot_dimension_numbers<[2], [1], [1], [2], [0, 0, 0, 1, 1, 2], [0], [0]>} : vector<2x8x8xbf16>, vector<2x8x64xbf16>, vector<2x8x64xf32> -> vector<2x8x64xf32>
    "tpu.trace_stop"() : () -> ()
    %103 = arith.truncf %102 : vector<2x8x64xf32> to vector<2x8x64xbf16>
    %c0_32 = arith.constant 0 : index
    %c0_33 = arith.constant 0 : index
    %c0_34 = arith.constant 0 : index
    %104 = vector.load %arg6[%c0_32, %c0_33, %c0_34] : memref<2x64x128xbf16, #tpu.memory_space<vmem>>, vector<2x64x128xbf16>
    "tpu.trace_start"() <{level = 10 : i32, message = "hqd,hdo->hqo"}> : () -> ()
    %cst_35 = arith.constant dense<0.000000e+00> : vector<2x8x128xf32>
    %105 = tpu.matmul %103, %104, %cst_35 {dimension_numbers = #tpu.dot_dimension_numbers<[2], [1], [1], [2], [0, 0, 0, 1, 1, 2], [0], [0]>} : vector<2x8x64xbf16>, vector<2x64x128xbf16>, vector<2x8x128xf32> -> vector<2x8x128xf32>
    "tpu.trace_stop"() : () -> ()
    %cst_36 = arith.constant dense<0.000000e+00> : vector<8x128xf32>
    %106 = vector.multi_reduction <add>, %105, %cst_36 [0] : vector<2x8x128xf32> to vector<8x128xf32>
    %107 = vector.extract_strided_slice %0 {offsets = [5, 0], sizes = [1, 128], strides = [1, 1]} : vector<16x384xf32> to vector<1x128xf32>
    %108 = vector.broadcast %107 : vector<1x128xf32> to vector<8x128xf32>
    %109 = arith.addf %106, %108 : vector<8x128xf32>
    %110 = arith.addf %65, %109 : vector<8x128xf32>
    %111 = vector.extract_strided_slice %0 {offsets = [6, 0], sizes = [1, 128], strides = [1, 1]} : vector<16x384xf32> to vector<1x128xf32>
    %112 = vector.extract_strided_slice %0 {offsets = [7, 0], sizes = [1, 128], strides = [1, 1]} : vector<16x384xf32> to vector<1x128xf32>
    %cst_37 = arith.constant dense<0.000000e+00> : vector<8xf32>
    %113 = vector.multi_reduction <add>, %110, %cst_37 [1] : vector<8x128xf32> to vector<8xf32>
    %114 = vector.shape_cast %113 : vector<8xf32> to vector<8x1xf32>
    %cst_38 = arith.constant 1.280000e+02 : f32
    %115 = vector.broadcast %cst_38 : f32 to vector<8x1xf32>
    %116 = arith.divf %114, %115 : vector<8x1xf32>
    %117 = vector.broadcast %116 : vector<8x1xf32> to vector<8x128xf32>
    %118 = arith.subf %110, %117 : vector<8x128xf32>
    %119 = arith.mulf %118, %118 : vector<8x128xf32>
    %cst_39 = arith.constant dense<0.000000e+00> : vector<8xf32>
    %120 = vector.multi_reduction <add>, %119, %cst_39 [1] : vector<8x128xf32> to vector<8xf32>
    %121 = vector.shape_cast %120 : vector<8xf32> to vector<8x1xf32>
    %cst_40 = arith.constant 1.280000e+02 : f32
    %122 = vector.broadcast %cst_40 : f32 to vector<8x1xf32>
    %123 = arith.divf %121, %122 : vector<8x1xf32>
    %124 = vector.broadcast %116 : vector<8x1xf32> to vector<8x128xf32>
    %125 = arith.subf %110, %124 : vector<8x128xf32>
    %cst_41 = arith.constant 9.99999974E-6 : f32
    %126 = vector.broadcast %cst_41 : f32 to vector<8x1xf32>
    %127 = arith.addf %123, %126 : vector<8x1xf32>
    %128 = math.rsqrt %127 : vector<8x1xf32>
    %129 = vector.broadcast %128 : vector<8x1xf32> to vector<8x128xf32>
    %130 = arith.mulf %125, %129 : vector<8x128xf32>
    %131 = vector.broadcast %111 : vector<1x128xf32> to vector<8x128xf32>
    %132 = arith.mulf %130, %131 : vector<8x128xf32>
    %133 = vector.broadcast %112 : vector<1x128xf32> to vector<8x128xf32>
    %134 = arith.addf %132, %133 : vector<8x128xf32>
    %135 = arith.truncf %134 : vector<8x128xf32> to vector<8x128xbf16>
    %c0_42 = arith.constant 0 : index
    %c0_43 = arith.constant 0 : index
    %136 = vector.load %arg7[%c0_42, %c0_43] : memref<128x256xbf16, #tpu.memory_space<vmem>>, vector<128x256xbf16>
    %cst_44 = arith.constant dense<0.000000e+00> : vector<8x256xf32>
    %137 = tpu.matmul %135, %136, %cst_44 {dimension_numbers = #tpu.dot_dimension_numbers<[1], [0], [0], [1], [0, 0, 1, 1], [], []>} : vector<8x128xbf16>, vector<128x256xbf16>, vector<8x256xf32> -> vector<8x256xf32>
    %138 = vector.extract_strided_slice %0 {offsets = [8, 0], sizes = [1, 256], strides = [1, 1]} : vector<16x384xf32> to vector<1x256xf32>
    %139 = vector.broadcast %138 : vector<1x256xf32> to vector<8x256xf32>
    %140 = arith.addf %137, %139 : vector<8x256xf32>
    %cst_45 = arith.constant 0.000000e+00 : f32
    %141 = vector.broadcast %cst_45 : f32 to vector<8x256xf32>
    %142 = arith.maximumf %140, %141 : vector<8x256xf32>
    %143 = arith.truncf %142 : vector<8x256xf32> to vector<8x256xbf16>
    %c0_46 = arith.constant 0 : index
    %c0_47 = arith.constant 0 : index
    %144 = vector.load %arg8[%c0_46, %c0_47] : memref<256x128xbf16, #tpu.memory_space<vmem>>, vector<256x128xbf16>
    %cst_48 = arith.constant dense<0.000000e+00> : vector<8x128xf32>
    %145 = tpu.matmul %143, %144, %cst_48 {dimension_numbers = #tpu.dot_dimension_numbers<[1], [0], [0], [1], [0, 0, 1, 1], [], []>} : vector<8x256xbf16>, vector<256x128xbf16>, vector<8x128xf32> -> vector<8x128xf32>
    %146 = vector.extract_strided_slice %0 {offsets = [9, 0], sizes = [1, 128], strides = [1, 1]} : vector<16x384xf32> to vector<1x128xf32>
    %147 = vector.broadcast %146 : vector<1x128xf32> to vector<8x128xf32>
    %148 = arith.addf %145, %147 : vector<8x128xf32>
    %149 = arith.addf %134, %148 : vector<8x128xf32>
    %150 = vector.extract_strided_slice %0 {offsets = [10, 0], sizes = [1, 128], strides = [1, 1]} : vector<16x384xf32> to vector<1x128xf32>
    %151 = vector.extract_strided_slice %0 {offsets = [11, 0], sizes = [1, 128], strides = [1, 1]} : vector<16x384xf32> to vector<1x128xf32>
    %cst_49 = arith.constant dense<0.000000e+00> : vector<8xf32>
    %152 = vector.multi_reduction <add>, %149, %cst_49 [1] : vector<8x128xf32> to vector<8xf32>
    %153 = vector.shape_cast %152 : vector<8xf32> to vector<8x1xf32>
    %cst_50 = arith.constant 1.280000e+02 : f32
    %154 = vector.broadcast %cst_50 : f32 to vector<8x1xf32>
    %155 = arith.divf %153, %154 : vector<8x1xf32>
    %156 = vector.broadcast %155 : vector<8x1xf32> to vector<8x128xf32>
    %157 = arith.subf %149, %156 : vector<8x128xf32>
    %158 = arith.mulf %157, %157 : vector<8x128xf32>
    %cst_51 = arith.constant dense<0.000000e+00> : vector<8xf32>
    %159 = vector.multi_reduction <add>, %158, %cst_51 [1] : vector<8x128xf32> to vector<8xf32>
    %160 = vector.shape_cast %159 : vector<8xf32> to vector<8x1xf32>
    %cst_52 = arith.constant 1.280000e+02 : f32
    %161 = vector.broadcast %cst_52 : f32 to vector<8x1xf32>
    %162 = arith.divf %160, %161 : vector<8x1xf32>
    %163 = vector.broadcast %155 : vector<8x1xf32> to vector<8x128xf32>
    %164 = arith.subf %149, %163 : vector<8x128xf32>
    %cst_53 = arith.constant 9.99999974E-6 : f32
    %165 = vector.broadcast %cst_53 : f32 to vector<8x1xf32>
    %166 = arith.addf %162, %165 : vector<8x1xf32>
    %167 = math.rsqrt %166 : vector<8x1xf32>
    %168 = vector.broadcast %167 : vector<8x1xf32> to vector<8x128xf32>
    %169 = arith.mulf %164, %168 : vector<8x128xf32>
    %170 = vector.broadcast %150 : vector<1x128xf32> to vector<8x128xf32>
    %171 = arith.mulf %169, %170 : vector<8x128xf32>
    %172 = vector.broadcast %151 : vector<1x128xf32> to vector<8x128xf32>
    %173 = arith.addf %171, %172 : vector<8x128xf32>
    %c0_54 = arith.constant 0 : index
    %c0_55 = arith.constant 0 : index
    %c0_56 = arith.constant 0 : index
    %174 = vector.load %arg9[%c0_54, %c0_55, %c0_56] : memref<1x8x128xf32, #tpu.memory_space<vmem>>, vector<1x8x128xf32>
    %175 = vector.shape_cast %174 : vector<1x8x128xf32> to vector<8x128xf32>
    %176 = vector.shape_cast %173 : vector<8x128xf32> to vector<1x8x128xf32>
    tpu.vector_store %arg9[%c0_54, %c0_55, %c0_56], %176 {strides = array<i32>} : memref<1x8x128xf32, #tpu.memory_space<vmem>>, vector<1x8x128xf32>,
    return
  }
  func.func @transform_0(%arg0: i32) -> (i32, i32, i32) {
    %c0_i32 = arith.constant 0 : i32
    %c0_i32_0 = arith.constant 0 : i32
    %c0_i32_1 = arith.constant 0 : i32
    return %arg0, %c0_i32, %c0_i32_0 : i32, i32, i32
  }
  func.func @transform_1(%arg0: i32) -> (i32, i32) {
    %c0_i32 = arith.constant 0 : i32
    %c0_i32_0 = arith.constant 0 : i32
    %c0_i32_1 = arith.constant 0 : i32
    return %c0_i32, %c0_i32_0 : i32, i32
  }
  func.func @transform_2(%arg0: i32) -> (i32, i32) {
    %c0_i32 = arith.constant 0 : i32
    %c0_i32_0 = arith.constant 0 : i32
    %c0_i32_1 = arith.constant 0 : i32
    return %c0_i32, %c0_i32_0 : i32, i32
  }
  func.func @transform_3(%arg0: i32) -> (i32, i32) {
    %c0_i32 = arith.constant 0 : i32
    %c0_i32_0 = arith.constant 0 : i32
    %c0_i32_1 = arith.constant 0 : i32
    return %c0_i32, %c0_i32_0 : i32, i32
  }
  func.func @transform_4(%arg0: i32) -> (i32, i32) {
    %c0_i32 = arith.constant 0 : i32
    %c0_i32_0 = arith.constant 0 : i32
    %c0_i32_1 = arith.constant 0 : i32
    return %c0_i32, %c0_i32_0 : i32, i32
  }
  func.func @transform_5(%arg0: i32) -> (i32, i32, i32) {
    %c0_i32 = arith.constant 0 : i32
    %c0_i32_0 = arith.constant 0 : i32
    %c0_i32_1 = arith.constant 0 : i32
    %c0_i32_2 = arith.constant 0 : i32
    return %c0_i32, %c0_i32_0, %c0_i32_1 : i32, i32, i32
  }
  func.func @transform_6(%arg0: i32) -> (i32, i32) {
    %c0_i32 = arith.constant 0 : i32
    %c0_i32_0 = arith.constant 0 : i32
    %c0_i32_1 = arith.constant 0 : i32
    return %c0_i32, %c0_i32_0 : i32, i32
  }
  func.func @transform_7(%arg0: i32) -> (i32, i32) {
    %c0_i32 = arith.constant 0 : i32
    %c0_i32_0 = arith.constant 0 : i32
    %c0_i32_1 = arith.constant 0 : i32
    return %c0_i32, %c0_i32_0 : i32, i32
  }
  func.func @transform_8(%arg0: i32) -> (i32, i32, i32) {
    %c0_i32 = arith.constant 0 : i32
    %c0_i32_0 = arith.constant 0 : i32
    %c0_i32_1 = arith.constant 0 : i32
    return %arg0, %c0_i32, %c0_i32_0 : i32, i32, i32
  }
}

</mosaic_0001>

<bundles_post_ra>
// kernel: tpu_custom_call.1
= control target key start
LH: loop header
LB: loop body
LE: loop exit
PB: predicated region body
PF: predicated region fallthrough
CT: control target
= control target key end

     0   :  { %s3571_s0 = inlined_call_operand.hbm [shape: f32[2,8,128], index: 0, kind: input, shape index: {}]   ;;  %s3572_s1 = inlined_call_operand.hbm [shape: f32[16,384], index: 1, kind: input, shape index: {}]   ;;  %s3573_s2 = inlined_call_operand.hbm [shape: bf16[384,128], index: 2, kind: input, shape index: {}]   ;;  %s3574_s3 = inlined_call_operand.hbm [shape: bf16[384,128], index: 3, kind: input, shape index: {}]   ;;  %s3575_s4 = inlined_call_operand.hbm [shape: bf16[128,384], index: 4, kind: input, shape index: {}]   ;;  %s3576_s5 = inlined_call_operand.hbm [shape: bf16[2,64,128], index: 5, kind: input, shape index: {}]   ;;  %s3577_s6 = inlined_call_operand.hbm [shape: bf16[128,256], index: 6, kind: input, shape index: {}]   ;;  %s3578_s7 = inlined_call_operand.hbm [shape: bf16[256,128], index: 7, kind: input, shape index: {}]   ;;  %s3579_s8 = inlined_call_operand.hbm [shape: f32[2,8,128], index: 8, kind: output, shape index: {}]  }
   0x1   :  { %3584 = sst [smem:[#allocation23_spill]] %s3572_s1 }
   0x2   :  { %3585 = sst [smem:[#allocation24_spill]] %s3573_s2 }
   0x3   :  { %3586 = sst [smem:[#allocation25_spill]] %s3574_s3 }
   0x4   :  { %13 = vsyncpa [#allocation3], 0 }
   0x5   :  { %15 = vsyncpa [#allocation3 + $0x1], 0 }
   0x6   :  { %16 = vsyncpa [#allocation6], 0 }
   0x7   :  { %17 = vsyncpa [#allocation9], 0 }
   0x8   :  { %18 = vsyncpa [#allocation12], 0 }
   0x9   :  { %19 = vsyncpa [#allocation15], 0 }
   0xa   :  { %20 = vsyncpa [#allocation4], 0 }
   0xb   :  { %22 = vsyncpa [#allocation4 + $0x1], 0  ;;  %s3197_s27 = smov 0   ;;  %s3199_s28 = smov 0  }
   0xc   :  { %s3201_s29 = smov 0   ;;  %s3203_s30 = smov 0  }
   0xd LB: > { %s3131_s9 = smov [#allocation5]   ;;  %s3218_s11 = sadd.s32 4294967295, %s3129_s30   ;;  %s3129_s30 = sphi %s3203_s30, %s3617_s30   ;;  %s3125_s29 = sphi %s3201_s29, %s3616_s29   ;;  %s3121_s28 = sphi %s3199_s28, %s3615_s28   ;;  %s3117_s27 = sphi %s3197_s27, %s3614_s27  }
   0xe   : > { %s244_s10 = sshll.u32 %s3131_s9, 4  ;;  %p2184_p0 = scmp.ge.s32.totalorder %s3129_s30, 1  ;;  %s245_s10 = int_to_ptr.vmem [resolvable:$true] %s244_s10 }
   0xf   : > { %p3580_p1 = scmp.eq.s32.totalorder %s3218_s11, 0  ;;  %p232_p2 = scmp.lt.s32.totalorder %s3129_s30, 3 }
  0x10   : > { %s3132_s14 = smov [#allocation8]   ;;  %s3133_s16 = smov [#allocation11]  }
  0x11   : > { %p3223_p3 = pnand %p2184_p0, %p232_p2  ;;  %s270_s15 = sshll.u32 %s3132_s14, 4  ;;  %s3236_s15 = int_to_ptr.vmem [resolvable:$true] %s270_s15 }
  0x12   : > { %s3238_s17 = sshll.u32 %s3133_s16, 4  ;;  %s2850_s19 = scalar_lea.vmem %s245_s10, 768  ;;  %s297_s17 = int_to_ptr.vmem [resolvable:$true] %s3238_s17 }
  0x13   : > { %s3587_s12 = scalar_select %p3223_p3, 1, 0 }
  0x14   : > { %p2600_p5 = pneg %p3223_p3  ;;  %p2851_p8 = scmp.ne.s32.totalorder %s245_s10, %s2850_s19 }
  0x15   : > { %p2858_p11 = scmp.lt.s32.totalorder %s245_s10, %s245_s10  ;;  %p2859_p12 = scmp.lt.s32.totalorder %s2850_s19, %s2850_s19 }
  0x16   : > { %p3232_p6 = pnand %p2600_p5, %p3580_p1 }
  0x17   : > { %p2860_p13 = por %p2859_p12, %p2858_p11 }
  0x18   : > { %p3242_p7 = pneg %p3232_p6 }
  0x1a   : > { %p2853_p9 = pnand %p2851_p8, %p3242_p7 }
  0x1c   : > { %p2854_p10 = pneg %p2853_p9 }
  0x1e   : > { %p2861_p0 = pnand %p2860_p13, %p2854_p10 }
  0x20   : > { %2864 = shalt.err (!%p2861_p0)
}
  0x21   : > { %s3134_s20 = smov 384   ;;  %s3135_s21 = smov 24  }
  0x22   : > { %s3590_s1 = sld [smem:[#allocation23_spill]]  ;;  %s2876_s24 = scalar_lea.vmem %s3236_s15, 3072 }
  0x23   : > { %p2877_p2 = scmp.ne.s32.totalorder %s3236_s15, %s2876_s24  ;;  %p2884_p9 = scmp.lt.s32.totalorder %s3236_s15, %s3236_s15 }
  0x24   : > { %p2885_p10 = scmp.lt.s32.totalorder %s2876_s24, %s2876_s24 }
  0x25   : > { %p2879_p5 = pnand %p2877_p2, %p3242_p7 }
  0x26   : > { %p2886_p11 = por %p2885_p10, %p2884_p9 }
  0x27   : > { %p2880_p8 = pneg %p2879_p5 }
  0x28   : > { %2603 = dma.hbm_to_vmem [thread:$0]  (!%p3232_p6), %s3590_s1, 768, %s245_s10, [#allocation6], %s3134_s20, %s3134_s20, %s3135_s21  }
  0x29   : > { %p2887_p12 = pnand %p2886_p11, %p2880_p8 }
  0x2b   : > { %2890 = shalt.err (!%p2887_p12)
}
  0x2c   : > { %s3136_s25 = smov 64   ;;  %s3137_s26 = smov 4  }
  0x2d   : > { %s3591_s3 = sld [smem:[#allocation25_spill]]  ;;  %s2902_s14 = scalar_lea.vmem %s297_s17, 1024 }
  0x2e   : > { %p2903_p13 = scmp.ne.s32.totalorder %s297_s17, %s2902_s14  ;;  %p2910_p5 = scmp.lt.s32.totalorder %s297_s17, %s297_s17 }
  0x2f   : > { %p2911_p8 = scmp.lt.s32.totalorder %s2902_s14, %s2902_s14 }
  0x30   : > { %p2905_p0 = pnand %p2903_p13, %p3242_p7 }
  0x31   : > { %p2912_p9 = por %p2911_p8, %p2910_p5 }
  0x32   : > { %p2906_p2 = pneg %p2905_p0 }
  0x33   : > { %2609 = dma.hbm_to_vmem [thread:$0]  (!%p3232_p6), %s3591_s3, 3072, %s3236_s15, [#allocation9], %s3136_s25, %s3136_s25, %s3137_s26  }
  0x34   : > { %p2913_p10 = pnand %p2912_p9, %p2906_p2 }
  0x36   : > { %2916 = shalt.err (!%p2913_p10)
}
  0x37   : > { %2615 = dma.hbm_to_vmem [thread:$0]  (!%p3232_p6), %s3576_s5, 1024, %s297_s17, [#allocation12], %s3136_s25, %s3136_s25, %s3137_s26  }
  0x38   : > { %s3138_s15 = smov [#allocation7]   ;;  %s3139_s21 = smov [#allocation10]  }
  0x39   : > { %s257_s20 = sshll.u32 %s3138_s15, 4  ;;  %s283_s22 = sshll.u32 %s3139_s21, 4  ;;  %s258_s20 = int_to_ptr.vmem [resolvable:$true] %s257_s20  ;;  %s284_s22 = int_to_ptr.vmem [resolvable:$true] %s283_s22 }
  0x3a   : > { %s2928_s23 = scalar_lea.vmem %s258_s20, 3072  ;;  %p2936_p0 = scmp.lt.s32.totalorder %s258_s20, %s258_s20 }
  0x3b   : > { %p2929_p11 = scmp.ne.s32.totalorder %s258_s20, %s2928_s23  ;;  %p2937_p2 = scmp.lt.s32.totalorder %s2928_s23, %s2928_s23 }
  0x3d   : > { %p2931_p12 = pnand %p2929_p11, %p3242_p7  ;;  %p2938_p5 = por %p2937_p2, %p2936_p0 }
  0x3f   : > { %p2932_p13 = pneg %p2931_p12 }
  0x41   : > { %p2939_p8 = pnand %p2938_p5, %p2932_p13 }
  0x43   : > { %2942 = shalt.err (!%p2939_p8)
}
  0x44   : > { %s3592_s2 = sld [smem:[#allocation24_spill]]  ;;  %s2954_s9 = scalar_lea.vmem %s284_s22, 3072 }
  0x45   : > { %p2955_p9 = scmp.ne.s32.totalorder %s284_s22, %s2954_s9  ;;  %p2962_p12 = scmp.lt.s32.totalorder %s284_s22, %s284_s22 }
  0x46   : > { %p2963_p0 = scmp.lt.s32.totalorder %s2954_s9, %s2954_s9 }
  0x47   : > { %p2957_p10 = pnand %p2955_p9, %p3242_p7 }
  0x48   : > { %p2964_p13 = por %p2963_p0, %p2962_p12 }
  0x49   : > { %p2958_p11 = pneg %p2957_p10 }
  0x4a   : > { %2606 = dma.hbm_to_vmem [thread:$0]  (!%p3232_p6), %s3592_s2, 3072, %s258_s20, [#allocation6], %s3136_s25, %s3136_s25, %s3137_s26  }
  0x4b   : > { %p2965_p2 = pnand %p2964_p13, %p2958_p11 }
  0x4d   : > { %2968 = shalt.err (!%p2965_p2)
}
  0x4e   : > { %s3140_s10 = smov 192   ;;  %s3141_s14 = smov 12  }
  0x4f   : > { %2612 = dma.hbm_to_vmem [thread:$0]  (!%p3232_p6), %s3575_s4, 3072, %s284_s22, [#allocation9], %s3140_s10, %s3140_s10, %s3141_s14  }
  0x50   : > { %s3142_s15 = smov [#allocation13]  }
  0x51   : > { %s309_s20 = sshll.u32 %s3142_s15, 4  ;;  %s310_s20 = int_to_ptr.vmem [resolvable:$true] %s309_s20 }
  0x52   : > { %s2980_s21 = scalar_lea.vmem %s310_s20, 2048  ;;  %p2988_p10 = scmp.lt.s32.totalorder %s310_s20, %s310_s20 }
  0x53   : > { %p2981_p5 = scmp.ne.s32.totalorder %s310_s20, %s2980_s21  ;;  %p2989_p11 = scmp.lt.s32.totalorder %s2980_s21, %s2980_s21 }
  0x55   : > { %p2983_p8 = pnand %p2981_p5, %p3242_p7  ;;  %p2990_p12 = por %p2989_p11, %p2988_p10 }
  0x57   : > { %p2984_p9 = pneg %p2983_p8 }
  0x59   : > { %p2991_p0 = pnand %p2990_p12, %p2984_p9 }
  0x5b   : > { %2994 = shalt.err (!%p2991_p0)
}
  0x5c   : > { %s3143_s23 = smov 128   ;;  %s3144_s17 = smov 8  }
  0x5d   : > { %2618 = dma.hbm_to_vmem [thread:$0]  (!%p3232_p6), %s3577_s6, 2048, %s310_s20, [#allocation12], %s3143_s23, %s3143_s23, %s3144_s17  }
  0x5e   : > { %s3145_s9 = smov [#allocation14]  }
  0x5f   : > { %s322_s10 = sshll.u32 %s3145_s9, 4  ;;  %s323_s10 = int_to_ptr.vmem [resolvable:$true] %s322_s10 }
  0x60   : > { %s3006_s14 = scalar_lea.vmem %s323_s10, 2048  ;;  %p3014_p8 = scmp.lt.s32.totalorder %s323_s10, %s323_s10 }
  0x61   : > { %p3007_p13 = scmp.ne.s32.totalorder %s323_s10, %s3006_s14  ;;  %p3015_p9 = scmp.lt.s32.totalorder %s3006_s14, %s3006_s14 }
  0x63   : > { %p3009_p2 = pnand %p3007_p13, %p3242_p7  ;;  %p3016_p10 = por %p3015_p9, %p3014_p8 }
  0x65   : > { %p3010_p5 = pneg %p3009_p2 }
  0x67   : > { %p3017_p11 = pnand %p3016_p10, %p3010_p5 }
  0x69   : > { %3020 = shalt.err (!%p3017_p11)
}
  0x6a   : > { %2621 = dma.hbm_to_vmem [thread:$0]  (!%p3232_p6), %s3578_s7, 2048, %s323_s10, [#allocation15], %s3136_s25, %s3136_s25, %s3137_s26  }
  0x6b   : > { %s2183_s13 = sadd.s32 4294967294, %s3129_s30   ;;  %s3315_s18 = sadd.s32 1, %s3129_s30  }
  0x6c   : > { %s35_s15 = sadd.s32 1, %s3125_s29  ;;  %s32_s20 = ssub.s32 %s3129_s30, %s3315_s18 }
  0x6d   : > { %p42_p7 = scmp.ne.s32.totalorder %s3125_s29, %s3121_s28  ;;  %p33_p12 = scmp.eq.s32.totalorder %s32_s20, 0 }
  0x6e   : > { %p43_p0 = scmp.eq.s32.totalorder %s3129_s30, 0  ;;  %p48_p13 = scmp.ne.s32.totalorder %s3121_s28, %s3117_s27 }
  0x6f   : > { %p219_p2 = scmp.eq.s32.totalorder %s3218_s11, 1  ;;  %p225_p9 = scmp.eq.s32.totalorder %s2183_s13, 1 }
  0x70   : > { %s3327_s21 = scalar_select %p33_p12, %s3125_s29, %s35_s15  }
  0x71   : > { %p44_p5 = por %p43_p0, %p42_p7  ;;  %p3331_p8 = por %p3580_p1, %p48_p13 }
  0x72   : > { %p3335_p6 = por %p219_p2, %p42_p7  ;;  %p2637_p10 = scmp.lt.s32.totalorder %s3129_s30, 2 }
  0x73   : > { %s3593_s23 = scalar_select %p3331_p8, 1, 0 }
  0x74   : > { %s3594_s25 = scalar_select %p3335_p6, 1, 0 }
  0x75   : > { %s336_s26 = sand.u32 1, %s3125_s29   ;;  %p3341_p11 = por %p225_p9, %p48_p13 }
  0x76   : > { %s2193_s24 = sshll.u32 %s336_s26, 3  ;;  %s2194_s22 = sshll.u32 %s3129_s30, 7 }
  0x77   : > { %s3595_s17 = scalar_select %p3341_p11, 1, 0 }
  0x78   : > { %s3349_s14 = scalar_lea.hbm %s3571_s0, %s2194_s22  ;;  %s340_s16 = scalar_lea.vmem [#allocation2], %s2193_s24 }
  0x79   : > { %s347_s19 = sshll.u32 %s340_s16, 4  ;;  %p3351_p7 = pnand %p2637_p10, %p44_p5  ;;  %s348_s19 = int_to_ptr.vmem [resolvable:$true] %s347_s19 }
  0x7a   : > { %s337_s15 = scalar_lea.sflag [#allocation3], %s336_s26  ;;  %s3021_s20 = scalar_lea.hbm %s3349_s14, 128 }
  0x7b   : > { %p3022_p12 = scmp.ne.s32.totalorder %s3349_s14, %s3021_s20  ;;  %p3023_p0 = pneg %p3351_p7 }
  0x7c   : > { %s3026_s10 = scalar_lea.hbm %s3571_s0, 256  ;;  %p3027_p5 = scmp.lt.s32.totalorder %s3349_s14, %s3571_s0 }
  0x7d   : > { %p3024_p13 = pnand %p3023_p0, %p3022_p12  ;;  %p3028_p9 = scmp.lt.s32.totalorder %s3026_s10, %s3021_s20 }
  0x7f   : > { %p3025_p2 = pneg %p3024_p13  ;;  %p3029_p10 = por %p3028_p9, %p3027_p5 }
  0x81   : > { %p3030_p4 = pnand %p3029_p10, %p3025_p2 }
  0x83   : > { %3033 = shalt.err (!%p3030_p4)
}
  0x84   : > { %s3034_s16 = scalar_lea.vmem %s348_s19, 128  ;;  %s3146_s26 = smov [#allocation2]  }
  0x85   : > { %p3035_p1 = scmp.ne.s32.totalorder %s348_s19, %s3034_s16  ;;  %s3039_s2 = sshll.u32 %s3146_s26, 4  ;;  %s3040_s2 = int_to_ptr.vmem [resolvable:$false] %s3039_s2 }
  0x86   : > { %s3041_s3 = scalar_lea.vmem %s3040_s2, 256  ;;  %p3042_p12 = scmp.lt.s32.totalorder %s348_s19, %s3040_s2 }
  0x87   : > { %p3037_p11 = pnand %p3035_p1, %p3023_p0  ;;  %p3043_p13 = scmp.lt.s32.totalorder %s3041_s3, %s3034_s16 }
  0x89   : > { %p3038_p6 = pneg %p3037_p11  ;;  %p3044_p8 = por %p3043_p13, %p3042_p12 }
  0x8b   : > { %p3045_p3 = pnand %p3044_p8, %p3038_p6 }
  0x8d   : > { %3048 = shalt.err (!%p3045_p3)
}
  0x8e   : > { %2625 = dma.hbm_to_vmem [thread:$0]  (!%p3351_p7), %s3349_s14, 128, %s348_s19, %s337_s15  }
  0x8f   : > { %p3597_p2 = scmp.ne.s32.totalorder %s3587_s12, 0 }
  0x90   : > { %s3372_s1 = sand.u32 (!%p3597_p2), 1, %s3121_s28   ;;  %p3598_p1 = scmp.ne.s32.totalorder (!%p3597_p2), %s3593_s23, 0 }
  0x91   : > { %356 = sbr.rel (%p3597_p2) target bundleno = 3168 (0xc60), region = 52  ;;  %s2196_s20 = sshll.u32 (!%p3597_p2), %s3372_s1, 3 }
  0x92   : > { %s359_s2 = scalar_lea.sflag (!%p3597_p2), [#allocation3], %s3372_s1  ;;  %s3378_s3 = scalar_lea.vmem (!%p3597_p2), [#allocation2], %s2196_s20 }
  0x96   : > { %3092 = dma.done.wait (%p3598_p1), %s359_s2, 128  }
  0x97   : > { %3094 = vsyncadd (%p3598_p1), %s359_s2, 4294967168  ;;  %p3599_p3 = scmp.eq.s32.totalorder %s3218_s11, 0 }
  0x99   : > { %3096 = dma.done.wait (%p3599_p3), [#allocation6], 3840   ;;  %p3600_p4 = pmov %p3599_p3 }
  0x9a   : > { %p3601_p8 = pmov %p3599_p3 }
  0x9b   : > { %3098 = vsyncadd (%p3600_p4), [#allocation6], 4294963456 }
  0x9c   : > { %3100 = dma.done.wait (%p3601_p8), [#allocation9], 6144   ;;  %p3602_p6 = pmov %p3599_p3 }
  0x9d   : > { %p3603_p11 = pmov %p3599_p3 }
  0x9e   : > { %3102 = vsyncadd (%p3602_p6), [#allocation9], 4294961152 }
  0x9f   : > { %3104 = dma.done.wait (%p3603_p11), [#allocation12], 3072   ;;  %p3604_p7 = pmov %p3599_p3 }
  0xa0   : > { %p3605_p0 = pmov %p3599_p3 }
  0xa1   : > { %3106 = vsyncadd (%p3604_p7), [#allocation12], 4294964224 }
  0xa2   : > { %3108 = dma.done.wait (%p3605_p0), [#allocation15], 2048   ;;  %p3606_p5 = pmov %p3605_p0 }
  0xa3   : > { %v3147_v0 = vmov 0.0   ;;  %vm3148_vm0 = vmmov 0   ;;  %v2697_v1 = vld [vmem:[#allocation7 + $0x78] sm:$0xff]   ;;  %v2700_v4 = vld [vmem:[#allocation7 + $0x70] sm:$0xff]   ;;  %v2703_v7 = vld [vmem:[#allocation7 + $0x68] sm:$0xff]   ;;  %v430_v15 = vlaneseq  ;;  %vm1296_vm5 = vcmask 523264  }
  0xa4   : > { %3110 = vsyncadd (%p3606_p5), [#allocation15], 4294965248  ;;  %2460 = vmatprep.subr.bf16.mxu1 %v3147_v0  ;;  %2476 = vmatprep.mubr.msk.bf16.mxu1 %vm3148_vm0, %v3147_v0  ;;  %v2698_v2 = vld [vmem:[#allocation7 + $0x38] sm:$0xff]   ;;  %v2701_v5 = vld [vmem:[#allocation7 + $0x30] sm:$0xff]   ;;  %s3150_s12 = smov 64   ;;  %vm1417_vm6 = vcmask 1043456  }
  0xa5   : > { %2349 = vmatprep.subr.bf16.mxu0 %v2697_v1  ;;  %v2699_v3 = vld [vmem:[#allocation7 + $0xb8] sm:$0xff]   ;;  %v2702_v6 = vld [vmem:[#allocation7 + $0xb0] sm:$0xff]   ;;  %v2704_v8 = vld [vmem:[#allocation7 + $0x28] sm:$0xff]   ;;  %v3407_v19 = vshrl.u32 %v430_v15, 7  ;;  %vm1389_vm7 = vcmask 64512   ;;  %s2344_s23 = sshll.u32 %s3218_s11, 7 }
  0xa6   : > { %2350 = vmatpush3.bf16.msra.mxu0 %v2698_v2  ;;  %2461 = vmatpush3.bf16.msra.mxu1 %v2699_v3  ;;  %v2705_v9 = vld [vmem:[#allocation7 + $0xa8] sm:$0xff]   ;;  %v2706_v10 = vld [vmem:[#allocation7 + $0x60] sm:$0xff]   ;;  %v2709_v13 = vld [vmem:[#allocation7 + $0x58] sm:$0xff]   ;;  %s422_s14 = scalar_lea.vmem [#allocation16], %s2196_s20  ;;  %s2044_s22 = scalar_lea.hbm %s3579_s8, %s2344_s23 }
  0xa7   : > { %2351 = vmatprep.subr.bf16.mxu0 %v2700_v4  ;;  %2462 = vmatprep.subr.bf16.mxu1 %v3147_v0  ;;  %v2707_v11 = vld [vmem:[#allocation7 + $0x20] sm:$0xff]   ;;  %v2710_v14 = vld [vmem:[#allocation7 + $0x18] sm:$0xff]   ;;  %v2712_v17 = vld [vmem:[#allocation7 + $0x50] sm:$0xff]   ;;  %vm2347_vm1 = vcmp.ne.s32.totalorder %v3407_v19, 0  ;;  %vm2348_vm3 = vcmp.ne.s32.totalorder %v3407_v19, 7  ;;  %v3439_v59 = vsub.s32 0, %v3407_v19 }
  0xa8   : > { %v2708_v12 = vld [vmem:[#allocation7 + $0xa0] sm:$0xff]   ;;  %v2711_v16 = vld [vmem:[#allocation7 + $0x98] sm:$0xff]   ;;  %v2713_v18 = vld [vmem:[#allocation7 + $0x10] sm:$0xff]   ;;  %s2046_s19 = sshll.u32 %s422_s14, 4  ;;  %s2033_s9 = scalar_lea.sflag [#allocation4], %s3372_s1  ;;  %s2047_s19 = int_to_ptr.vmem [resolvable:$true] %s2046_s19 }
  0xa9   : > { %v2714_v20 = vld [vmem:[#allocation7 + $0x90] sm:$0xff]   ;;  %v2715_v21 = vld [vmem:[#allocation7 + $0x48] sm:$0xff]   ;;  %v2718_v24 = vld [vmem:[#allocation7 + $0x40] sm:$0xff]   ;;  %s3049_s10 = scalar_lea.vmem %s2047_s19, 128  ;;  %p3611_p10 = scmp.ne.s32.totalorder %s3594_s25, 0 }
  0xaa   : > { %2352 = vmatpush3.bf16.msra.mxu0 %v2701_v5  ;;  %2463 = vmatpush3.bf16.msra.mxu1 %v2702_v6  ;;  %v2716_v22 = vld [vmem:[#allocation7 + $0x8] sm:$0xff]   ;;  %v2719_v26 = vld [vmem:[#allocation7] sm:$0xff]   ;;  %vm3413_vm2 = vmpackc.low %vm2347_vm1, %vm2347_vm1  ;;  %p3050_p9 = scmp.ne.s32.totalorder %s2047_s19, %s3049_s10  ;;  %s3151_s24 = smov [#allocation16]  }
  0xab   : > { %2353 = vmatprep.subr.bf16.mxu0 %v2703_v7  ;;  %2464 = vmatprep.subr.bf16.mxu1 %v3147_v0  ;;  %v2717_v23 = vld [vmem:[#allocation7 + $0x88] sm:$0xff]   ;;  %v2720_v30 = vld [vmem:[#allocation7 + $0x80] sm:$0xff]   ;;  %v2721_v32 = vld [vmem:[#allocation8 + $0x78] sm:$0xff]   ;;  %s3053_s16 = sshll.u32 %s3151_s24, 4  ;;  %s3054_s16 = int_to_ptr.vmem [resolvable:$false] %s3053_s16 }
  0xac   : > { %v429_v25 = vld [vmem:[%s3378_s3] sm:$0xff]  ;;  %vm3419_vm4 = vmpackc.low %vm2348_vm3, %vm2348_vm3  ;;  %v2722_v35 = vld [vmem:[#allocation8 + $0x38] sm:$0xff]   ;;  %p3051_p12 = pnand %p3050_p9, %p3611_p10  ;;  %s3055_s11 = scalar_lea.vmem %s3054_s16, 256 }
  0xad   : > { %v433_v27 = vrot.slane %v429_v25, 7  ;;  %v439_v28 = vpack.c.bf16 %v429_v25, %v429_v25  ;;  %v436_v31 = vrot.slane %v429_v25, 1  ;;  %v2723_v37 = vld [vmem:[#allocation8 + $0xb8] sm:$0xff]   ;;  %v2724_v38 = vld [vmem:[#allocation8 + $0x70] sm:$0xff]   ;;  %v2727_v41 = vld [vmem:[#allocation8 + $0x68] sm:$0xff]   ;;  %p3056_p2 = scmp.lt.s32.totalorder %s2047_s19, %s3054_s16  ;;  %p3057_p1 = scmp.lt.s32.totalorder %s3055_s11, %s3049_s10 }
  0xae   : > { %2354 = vmatpush3.bf16.msra.mxu0 %v2704_v8  ;;  %2465 = vmatpush3.bf16.msra.mxu1 %v2705_v9  ;;  %v2725_v39 = vld [vmem:[#allocation8 + $0x30] sm:$0xff]   ;;  %v2728_v42 = vld [vmem:[#allocation8 + $0x28] sm:$0xff]   ;;  %v2730_v44 = vld [vmem:[#allocation8 + $0x60] sm:$0xff]   ;;  %p3052_p13 = pneg %p3051_p12 }
  0xaf   : > { %2355 = vmatprep.subr.bf16.mxu0 %v2706_v10  ;;  %2466 = vmatprep.subr.bf16.mxu1 %v3147_v0  ;;  %v2232_v34 = vpack.c.bf16 %v433_v27, %v433_v27  ;;  %v2237_v36 = vpack.c.bf16 %v436_v31, %v436_v31  ;;  %v2726_v40 = vld [vmem:[#allocation8 + $0xb0] sm:$0xff]   ;;  %v2729_v43 = vld [vmem:[#allocation8 + $0xa8] sm:$0xff]   ;;  %v2731_v45 = vld [vmem:[#allocation8 + $0x20] sm:$0xff]   ;;  %p3058_p3 = por %p3057_p1, %p3056_p2 }
  0xb0   : > { %669 = vmatprep.mubr.bf16.mxu0 %v439_v28  ;;  %v2732_v46 = vld [vmem:[#allocation8 + $0xa0] sm:$0xff]   ;;  %v2733_v47 = vld [vmem:[#allocation8 + $0x58] sm:$0xff]   ;;  %v2736_v50 = vld [vmem:[#allocation8 + $0x50] sm:$0xff]  }
  0xb1   : > { %v2734_v48 = vld [vmem:[#allocation8 + $0x18] sm:$0xff]   ;;  %v2737_v51 = vld [vmem:[#allocation8 + $0x10] sm:$0xff]   ;;  %v2739_v53 = vld [vmem:[#allocation8 + $0x48] sm:$0xff]   ;;  %p3059_p4 = pnand %p3058_p3, %p3052_p13 }
  0xb2   : > { %2356 = vmatpush3.bf16.msra.mxu0 %v2707_v11  ;;  %2467 = vmatpush3.bf16.msra.mxu1 %v2708_v12  ;;  %v2735_v49 = vld [vmem:[#allocation8 + $0x98] sm:$0xff]   ;;  %v2738_v52 = vld [vmem:[#allocation8 + $0x90] sm:$0xff]   ;;  %v2740_v54 = vld [vmem:[#allocation8 + $0x8] sm:$0xff]  }
  0xb3   : > { %2357 = vmatprep.subr.bf16.mxu0 %v2709_v13  ;;  %2468 = vmatprep.subr.bf16.mxu1 %v3147_v0  ;;  %v2741_v55 = vld [vmem:[#allocation8 + $0x88] sm:$0xff]   ;;  %v2742_v56 = vld [vmem:[#allocation8 + $0x40] sm:$0xff]   ;;  %v3441_v60 = vld [vmem:[#allocation5] sm:$0xff] }
  0xb4   : > { %v2743_v57 = vld [vmem:[#allocation8] sm:$0xff]   ;;  %v492_v63 = vrot.slane %v3441_v60, %v3439_v59  ;;  %v2745_v31 = vld [vmem:[#allocation10 + $0xa8] ss:$12 sps:$4 sm:$0xff]   ;;  %v2748_v33 = vld [vmem:[#allocation10 + $0xb0] ss:$12 sps:$4 sm:$0xff]  }
  0xb5   : > { %v2744_v58 = vld [vmem:[#allocation8 + $0x80] sm:$0xff]  }
  0xb6   : > { %2358 = vmatpush3.bf16.msra.mxu0 %v2710_v14  ;;  %2469 = vmatpush3.bf16.msra.mxu1 %v2711_v16  ;;  %v775_v16 = vsub.s32 1, %v3407_v19 }
  0xb7   : > { %2359 = vmatprep.subr.bf16.mxu0 %v2712_v17  ;;  %2470 = vmatprep.subr.bf16.mxu1 %v3147_v0 }
  0xba   : > { %2360 = vmatpush3.bf16.msra.mxu0 %v2713_v18  ;;  %2471 = vmatpush3.bf16.msra.mxu1 %v2714_v20  ;;  %v776_v20 = vrot.slane %v3441_v60, %v775_v16 }
  0xbb   : > { %2361 = vmatprep.subr.bf16.mxu0 %v2715_v21  ;;  %2472 = vmatprep.subr.bf16.mxu1 %v3147_v0 }
  0xbe   : > { %2362 = vmatpush3.bf16.msra.mxu0 %v2716_v22  ;;  %2473 = vmatpush3.bf16.msra.mxu1 %v2717_v23 }
  0xbf   : > { %2363 = vmatprep.subr.bf16.mxu0 %v2718_v24  ;;  %2474 = vmatprep.subr.bf16.mxu1 %v3147_v0 }
  0xc2   : > { %2364 = vmatpush3.bf16.msra.mxu0 %v2719_v26  ;;  %2475 = vmatpush3.bf16.msra.mxu1 %v2720_v30 }
  0xc3   : > { %2380 = vmatprep.subr.bf16.mxu0 %v2721_v32  ;;  %2480 = vmatprep.subr.bf16.mxu1 %v3147_v0  ;;  %v2747_v32 = vld [vmem:[#allocation10 + $0xac] ss:$12 sps:$4 sm:$0xff]  }
  0xc5   : > { %2233 = vmatmul.mubr.msk.bf16.vlgmr.msra.gmra.mxu0 %vm3413_vm2, %v2232_v34  ;;  %2477 = vmatmul.mubr.msk.bf16.vlgmr.msra.gmra.mxu1 %vm3419_vm4, %v2237_v36  ;;  %v2751_v34 = vld [vmem:[#allocation10 + $0x94] ss:$12 sps:$4 sm:$0xff]   ;;  %v2749_v36 = vld [vmem:[#allocation10 + $0x90] ss:$12 sps:$4 sm:$0xff]  }
  0xc6   : > { %2381 = vmatpush3.bf16.msra.mxu0 %v2722_v35  ;;  %2481 = vmatpush3.bf16.msra.mxu1 %v2723_v37  ;;  %v2752_v35 = vld [vmem:[#allocation10 + $0x98] ss:$12 sps:$4 sm:$0xff]  }
  0xc7   : > { %2382 = vmatprep.subr.bf16.mxu0 %v2724_v38  ;;  %2482 = vmatprep.subr.bf16.mxu1 %v3147_v0 }
  0xc8   : > { %2496 = vmatprep.mubr.msk.bf16.mxu1 %vm3148_vm0, %v3147_v0 }
  0xca   : > { %2383 = vmatpush3.bf16.msra.mxu0 %v2725_v39  ;;  %2483 = vmatpush3.bf16.msra.mxu1 %v2726_v40 }
  0xcb   : > { %2384 = vmatprep.subr.bf16.mxu0 %v2727_v41  ;;  %2484 = vmatprep.subr.bf16.mxu1 %v3147_v0  ;;  %v2755_v41 = vld [vmem:[#allocation10 + $0x7c] ss:$12 sps:$4 sm:$0xff]  }
  0xce   : > { %2385 = vmatpush3.bf16.msra.mxu0 %v2728_v42  ;;  %2485 = vmatpush3.bf16.msra.mxu1 %v2729_v43  ;;  %v2753_v42 = vld [vmem:[#allocation10 + $0x78] ss:$12 sps:$4 sm:$0xff]   ;;  %v2756_v43 = vld [vmem:[#allocation10 + $0x80] ss:$12 sps:$4 sm:$0xff]  }
  0xcf   : > { %2386 = vmatprep.subr.bf16.mxu0 %v2730_v44  ;;  %2486 = vmatprep.subr.bf16.mxu1 %v3147_v0  ;;  %v2757_v44 = vld [vmem:[#allocation10 + $0x60] ss:$12 sps:$4 sm:$0xff]  }
  0xd2   : > { %2387 = vmatpush3.bf16.msra.mxu0 %v2731_v45  ;;  %2487 = vmatpush3.bf16.msra.mxu1 %v2732_v46  ;;  %v2759_v45 = vld [vmem:[#allocation10 + $0x64] ss:$12 sps:$4 sm:$0xff]   ;;  %v2760_v46 = vld [vmem:[#allocation10 + $0x68] ss:$12 sps:$4 sm:$0xff]  }
  0xd3   : > { %2388 = vmatprep.subr.bf16.mxu0 %v2733_v47  ;;  %2488 = vmatprep.subr.bf16.mxu1 %v3147_v0  ;;  %v2763_v47 = vld [vmem:[#allocation10 + $0x4c] ss:$12 sps:$4 sm:$0xff]  }
  0xd6   : > { %2389 = vmatpush3.bf16.msra.mxu0 %v2734_v48  ;;  %2489 = vmatpush3.bf16.msra.mxu1 %v2735_v49  ;;  %v2761_v48 = vld [vmem:[#allocation10 + $0x48] ss:$12 sps:$4 sm:$0xff]   ;;  %v2764_v49 = vld [vmem:[#allocation10 + $0x50] ss:$12 sps:$4 sm:$0xff]  }
  0xd7   : > { %2490 = vmatprep.subr.bf16.mxu1 %v3147_v0  ;;  %2390 = vmatprep.subr.bf16.mxu0 %v2736_v50  ;;  %v2767_v50 = vld [vmem:[#allocation10 + $0x34] ss:$12 sps:$4 sm:$0xff]  }
  0xda   : > { %2391 = vmatpush3.bf16.msra.mxu0 %v2737_v51  ;;  %2491 = vmatpush3.bf16.msra.mxu1 %v2738_v52  ;;  %v3149_v51 = vmov 0   ;;  %v2765_v52 = vld [vmem:[#allocation10 + $0x30] ss:$12 sps:$4 sm:$0xff]  }
  0xdb   : > { %2492 = vmatprep.subr.bf16.mxu1 %v3147_v0  ;;  %2392 = vmatprep.subr.bf16.mxu0 %v2739_v53  ;;  %v2768_v53 = vld [vmem:[#allocation10 + $0x38] ss:$12 sps:$4 sm:$0xff]  }
  0xde   : > { %2393 = vmatpush3.bf16.msra.mxu0 %v2740_v54  ;;  %2493 = vmatpush3.bf16.msra.mxu1 %v2741_v55  ;;  %v2771_v54 = vld [vmem:[#allocation10 + $0x1c] ss:$12 sps:$4 sm:$0xff]   ;;  %v2769_v55 = vld [vmem:[#allocation10 + $0x18] ss:$12 sps:$4 sm:$0xff]  }
  0xdf   : > { %2494 = vmatprep.subr.bf16.mxu1 %v3147_v0  ;;  %2394 = vmatprep.subr.bf16.mxu0 %v2742_v56  ;;  %v2772_v56 = vld [vmem:[#allocation10 + $0x20] ss:$12 sps:$4 sm:$0xff]  }
  0xe2   : > { %2395 = vmatpush3.bf16.msra.mxu0 %v2743_v57  ;;  %2495 = vmatpush3.bf16.msra.mxu1 %v2744_v58  ;;  %v2775_v57 = vld [vmem:[#allocation10 + $0x4] ss:$12 sps:$4 sm:$0xff]   ;;  %v2773_v58 = vld [vmem:[#allocation10] ss:$12 sps:$4 sm:$0xff]  }
  0xe3   : > { %2500 = vmatprep.subr.bf16.mxu1 %v3147_v0  ;;  %1197 = vmatprep.subr.bf16.mxu0 %v2747_v32 }
 0x185   : > { %v2365_v61 = vpop.f32.mrf.mxu0  ;;  %v711_v62 = vpop.f32.mrf.mxu1 }
 0x187   : > { %v2366_v1 = vpop.f32.mrf.mxu0  ;;  %v2478_v3 = vpop.f32.mrf.mxu1 }
 0x188   : > { %v2367_v2 = vadd.f32 %v2366_v1, %v2365_v61  ;;  %v2776_v61 = vld [vmem:[#allocation10 + $0x8] ss:$12 sps:$4 sm:$0xff]   ;;  %v1021_v3 = vsub.s32 3, %v3407_v19 }
 0x189   : > { %v2368_v4 = vpop.f32.mrf.mxu0  ;;  %v714_v6 = vpop.f32.mrf.mxu1 }
 0x18a   : > { %v672_v5 = vadd.f32 %v2367_v2, %v492_v63  ;;  %v1016_v2 = vsub.s32 2, %v3407_v19 }
 0x18b   : > { %v2369_v7 = vpop.f32.mrf.mxu0  ;;  %v2479_v9 = vpop.f32.mrf.mxu1 }
 0x18c   : > { %v712_v8 = vadd.f32 %v711_v62, %v672_v5  ;;  %v1017_v4 = vrot.slane %v3441_v60, %v1016_v2  ;;  %v1022_v7 = vrot.slane %v3441_v60, %v1021_v3 }
 0x18e   : > { %v717_v10 = vmax.f32 %v712_v8, 0.0 }
 0x190   : > { %v718_v11 = vrot.slane %v717_v10, 7  ;;  %v720_v12 = vrot.slane %v717_v10, 1  ;;  %v723_v13 = vpack.c.bf16 %v717_v10, %v717_v10 }
 0x192   : > { %v2266_v14 = vpack.c.bf16 %v718_v11, %v718_v11  ;;  %v2271_v15 = vpack.c.bf16 %v720_v12, %v720_v12  ;;  %953 = vmatprep.mubr.bf16.mxu0 %v723_v13  ;;  %v425_v11 = vld [vmem:[#allocation5 + $0x8] sm:$0xff]  ;;  %v1059_v12 = vsub.s32 4, %v3407_v19 }
 0x194   : > { %2267 = vmatmul.mubr.msk.bf16.vlgmr.msra.gmra.mxu0 %vm3413_vm2, %v2266_v14  ;;  %2497 = vmatmul.mubr.msk.bf16.vlgmr.msra.gmra.mxu1 %vm3419_vm4, %v2271_v15  ;;  %v1064_v13 = vrot.slane %v425_v11, %v1059_v12  ;;  %v426_v15 = vld [vmem:[#allocation5 + $0x10] sm:$0xff] }
 0x195   : > { %2516 = vmatprep.mubr.msk.bf16.mxu1 %vm3148_vm0, %v3147_v0  ;;  %2501 = vmatpush3.bf16.msra.mxu1 %v2748_v33 }
 0x196   : > { %1198 = vmatpush1.bf16.msra.mxu0 %v2745_v31  ;;  %2502 = vmatprep.subr.bf16.mxu1 %v3147_v0 }
 0x197   : > { %1199 = vmatprep.subr.bf16.mxu0 %v2751_v34  ;;  %1229 = vmatprep.mubr.bf16.mxu0 %v3149_v51 }
 0x199   : > { %2503 = vmatpush3.bf16.msra.mxu1 %v2752_v35 }
 0x19a   : > { %1200 = vmatpush1.bf16.msra.mxu0 %v2749_v36  ;;  %2504 = vmatprep.subr.bf16.mxu1 %v3147_v0 }
 0x19b   : > { %1201 = vmatprep.subr.bf16.mxu0 %v2755_v41 }
 0x19d   : > { %2505 = vmatpush3.bf16.msra.mxu1 %v2756_v43 }
 0x19e   : > { %1202 = vmatpush1.bf16.msra.mxu0 %v2753_v42  ;;  %2506 = vmatprep.subr.bf16.mxu1 %v3147_v0 }
 0x19f   : > { %1203 = vmatprep.subr.bf16.mxu0 %v2759_v45 }
 0x1a1   : > { %2507 = vmatpush3.bf16.msra.mxu1 %v2760_v46 }
 0x1a2   : > { %1204 = vmatpush1.bf16.msra.mxu0 %v2757_v44  ;;  %2508 = vmatprep.subr.bf16.mxu1 %v3147_v0 }
 0x1a3   : > { %1205 = vmatprep.subr.bf16.mxu0 %v2763_v47 }
 0x1a5   : > { %2509 = vmatpush3.bf16.msra.mxu1 %v2764_v49 }
 0x1a6   : > { %1206 = vmatpush1.bf16.msra.mxu0 %v2761_v48  ;;  %2510 = vmatprep.subr.bf16.mxu1 %v3147_v0 }
 0x1a7   : > { %1207 = vmatprep.subr.bf16.mxu0 %v2767_v50 }
 0x1a9   : > { %2511 = vmatpush3.bf16.msra.mxu1 %v2768_v53 }
 0x1aa   : > { %1208 = vmatpush1.bf16.msra.mxu0 %v2765_v52  ;;  %2512 = vmatprep.subr.bf16.mxu1 %v3147_v0 }
 0x1ab   : > { %1209 = vmatprep.subr.bf16.mxu0 %v2771_v54 }
 0x1ad   : > { %2513 = vmatpush3.bf16.msra.mxu1 %v2772_v56 }
 0x1ae   : > { %1210 = vmatpush1.bf16.msra.mxu0 %v2769_v55  ;;  %2514 = vmatprep.subr.bf16.mxu1 %v3147_v0 }
 0x1af   : > { %1211 = vmatprep.subr.bf16.mxu0 %v2775_v57 }
 0x1b1   : > { %2515 = vmatpush3.bf16.msra.mxu1 %v2776_v61 }
 0x1b2   : > { %1212 = vmatpush1.bf16.msra.mxu0 %v2773_v58  ;;  %2526 = vmatprep.subr.bf16.mxu1 %v3147_v0 }
 0x1b3   : > { %2520 = vmatprep.subr.bf16.mxu0 %v3147_v0 }
 0x254   : > { %v2396_v17 = vpop.f32.mrf.mxu0  ;;  %v995_v18 = vpop.f32.mrf.mxu1 }
 0x256   : > { %v2397_v21 = vpop.f32.mrf.mxu0  ;;  %v2498_v22 = vpop.f32.mrf.mxu1 }
 0x257   : > { %v2398_v23 = vadd.f32 %v2397_v21, %v2396_v17  ;;  %v1060_v21 = vrot.slane %v3441_v60, %v1059_v12  ;;  %v1068_v22 = vrot.slane %v426_v15, %v1059_v12 }
 0x258   : > { %v2399_v24 = vpop.f32.mrf.mxu0  ;;  %v998_v25 = vpop.f32.mrf.mxu1 }
 0x259   : > { %v956_v26 = vadd.f32 %v2398_v23, %v776_v20 }
 0x25a   : > { %v2400_v27 = vpop.f32.mrf.mxu0  ;;  %v2499_v28 = vpop.f32.mrf.mxu1 }
 0x25b   : > { %v996_v29 = vadd.f32 %v995_v18, %v956_v26 }
 0x25d   : > { %v1001_v30 = vmax.f32 %v996_v29, 0.0 }
 0x25f   : > { %1002 = vadd.xlane.f32.xlu0 %v1001_v30 }
 0x2e8   : > { %v1003_v37 = vpop.xlane.xlu0 %1002 }
 0x2e9   : > { %v1005_v38 = vmul.f32 0.0078125, %v1003_v37 }
 0x2eb   : > { %v1006_v39 = vsub.f32 %v1001_v30, %v1005_v38 }
 0x2ed   : > { %v1007_v40 = vmul.f32 %v1006_v39, %v1006_v39 }
 0x2ef   : > { %1008 = vadd.xlane.f32.xlu0 %v1007_v40 }
 0x378   : > { %v1009_v62 = vpop.xlane.xlu0 %1008 }
 0x379   : > { %v1010_v63 = vmul.f32 0.0078125, %v1009_v62 }
 0x37b   : > { %v1011_v1 = vadd.f32 1e-05, %v1010_v63 }
 0x37d   : > { %2825 = vrsqrt.f32 %v1011_v1 }
 0x38a   : > { %v2826_v5 = vpop.eup %2825 }
 0x38b   : > { %v1013_v6 = vmul.f32 %v2826_v5, %v1006_v39  ;;  %v2777_v5 = vld [vmem:[#allocation11 + $0x18] sm:$0xff]  }
 0x38d   : > { %v1018_v8 = vmul.f32 %v1017_v4, %v1013_v6 }
 0x38f   : > { %v3473_v9 = vadd.f32 %v1022_v7, %v1018_v8  ;;  %v2778_v7 = vld [vmem:[#allocation11 + $0x10] sm:$0xff]   ;;  %v2779_v8 = vld [vmem:[#allocation11 + $0x8] sm:$0xff]  }
 0x391   : > { %v1024_v10 = vpack.c.bf16 %v3473_v9, %v3473_v9 }
 0x393   : > { %1230 = vmatmul.mubr.bf16.vlgmr.msra.gmra.mxu0 %v1024_v10  ;;  %2517 = vmatmul.mubr.bf16.vlgmr.msra.gmra.mxu1 %v1024_v10  ;;  %v2780_v10 = vld [vmem:[#allocation11] sm:$0xff]  }
 0x394   : > { %2522 = vmatprep.mubr.msk.bf16.mxu0 %vm3148_vm0, %v3147_v0  ;;  %2528 = vmatprep.mubr.msk.bf16.mxu1 %vm3148_vm0, %v3147_v0 }
 0x453   : > { %v1231_v14 = vpop.f32.mrf.mxu0  ;;  %v1272_v17 = vpop.f32.mrf.mxu1 }
 0x454   : > { %v1232_v29 = vadd.f32 %v1231_v14, %v1060_v21  ;;  %v1273_v30 = vadd.f32 %v1272_v17, %v1068_v22  ;;  %v2782_v21 = vld [vmem:[#allocation11 + $0x30] sm:$0xff]   ;;  %v2783_v22 = vld [vmem:[#allocation11 + $0x28] sm:$0xff]  }
 0x455   : > { %v1233_v18 = vpop.f32.mrf.mxu0  ;;  %v2518_v20 = vpop.f32.mrf.mxu1 }
 0x456   : > { %v1234_v23 = vadd.f32 %v1233_v18, %v1064_v13  ;;  %v1294_v32 = vpack.c.bf16 %v1273_v30, %v1273_v30  ;;  %v1282_v33 = vpack.c.bf16 %v1232_v29, %v1232_v29  ;;  %v2781_v18 = vld [vmem:[#allocation11 + $0x38] sm:$0xff]  }
 0x457   : > { %v1235_v24 = vpop.f32.mrf.mxu0  ;;  %v1275_v25 = vpop.f32.mrf.mxu1 }
 0x458   : > { %v1288_v26 = vpack.c.bf16 %v1234_v23, %v1234_v23  ;;  %1285 = vrot.lane.b32.xlu1 %v1234_v23, %s3150_s12  ;;  %v1419_v34 = vsel %vm1417_vm6, %v1294_v32, 0  ;;  %v2784_v23 = vld [vmem:[#allocation11 + $0x20] sm:$0xff]  }
 0x459   : > { %v1236_v27 = vpop.f32.mrf.mxu0  ;;  %v2519_v28 = vpop.f32.mrf.mxu1 }
 0x45a   : > { %v1301_v31 = vsel %vm1296_vm5, %v1288_v26, 0 }
 0x45b   : > { %2521 = vmatpush3.bf16.xpose.msra.mxu0 %v1301_v31 }
 0x45c   : > { %1279 = vrot.lane.b32.xlu1 %v1232_v29, %s3150_s12  ;;  %2532 = vmatprep.subr.bf16.mxu0 %v3147_v0 }
 0x462   : > { %2523 = vmatmul.mubr.msk.bf16.vlgmr.msra.gmra.mxu0 %vm1296_vm5, %v1282_v33 }
 0x463   : > { %2533 = vmatpush3.bf16.msra.mxu0 %v1419_v34  ;;  %2534 = vmatprep.mubr.msk.bf16.mxu0 %vm3148_vm0, %v3147_v0 }
 0x464   : > { %2544 = vmatprep.subr.bf16.mxu0 %v3147_v0 }
 0x4ca   : > { %v1286_v35 = vpop.permute.xlu1 %1285 }
 0x4cb   : > { %v1289_v36 = vpack.c.bf16 %v1286_v35, %v1286_v35 }
 0x4cd   : > { %v1347_v37 = vsel %vm1296_vm5, %v1289_v36, 0 }
 0x4ce   : > { %2527 = vmatpush3.bf16.xpose.msra.mxu1 %v1347_v37  ;;  %v1280_v38 = vpop.permute.xlu1 %1279  ;;  %v1662_v37 = vsub.s32 5, %v3407_v19 }
 0x4cf   : > { %2538 = vmatprep.subr.bf16.mxu1 %v3147_v0  ;;  %v1283_v39 = vpack.c.bf16 %v1280_v38, %v1280_v38 }
 0x4d0   : > { %v1663_v38 = vrot.slane %v3441_v60, %v1662_v37  ;;  %v428_v37 = vld [vmem:[#allocation5 + $0x20] sm:$0xff] }
 0x4d5   : > { %2529 = vmatmul.mubr.msk.bf16.vlgmr.msra.gmra.mxu1 %vm1296_vm5, %v1283_v39 }
 0x4d6   : > { %2540 = vmatprep.mubr.msk.bf16.mxu1 %vm3148_vm0, %v3147_v0 }
 0x522   : > { %v1337_v40 = vpop.f32.mrf.mxu0 }
 0x523   : > { %v1390_v41 = vsel %vm1389_vm7, %v1337_v40, -inf }
 0x524   : > { %1391 = vmax.xlane.f32.xlu0 %v1390_v41  ;;  %v2524_v42 = vpop.f32.mrf.mxu0 }
 0x526   : > { %v1340_v43 = vpop.f32.mrf.mxu0 }
 0x528   : > { %v2525_v44 = vpop.f32.mrf.mxu0 }
 0x595   : > { %v1383_v45 = vpop.f32.mrf.mxu1 }
 0x596   : > { %v1393_v46 = vsel %vm1389_vm7, %v1383_v45, -inf }
 0x597   : > { %1394 = vmax.xlane.f32.xlu1 %v1393_v46  ;;  %v2530_v47 = vpop.f32.mrf.mxu1  ;;  %v2787_v46 = vld [vmem:[#allocation13 + $0x74] ss:$8 sps:$4 sm:$0xff]  }
 0x598   : > { %v2790_v47 = vld [vmem:[#allocation13 + $0x64] ss:$8 sps:$4 sm:$0xff]  }
 0x599   : > { %v1386_v48 = vpop.f32.mrf.mxu1 }
 0x59a   : > { %v2788_v48 = vld [vmem:[#allocation13 + $0x60] ss:$8 sps:$4 sm:$0xff]  }
 0x59b   : > { %v2531_v49 = vpop.f32.mrf.mxu1 }
 0x5ad   : > { %v1392_v50 = vpop.xlane.xlu0 %1391 }
 0x5ae   : > { %v1396_v52 = vsub.f32 %v1337_v40, %v1392_v50 }
 0x5b0   : > { %v1398_v53 = vmul.f32 1.442695, %v1396_v52 }
 0x5b2   : > { %2827 = vpow2.f32 %v1398_v53 }
 0x5bf   : > { %v2828_v54 = vpop.eup %2827 }
 0x5c0   : > { %v1402_v55 = vsel %vm1389_vm7, %v2828_v54, 0.0 }
 0x5c1   : > { %1403 = vadd.xlane.f32.xlu0 %v1402_v55  ;;  %v2791_v55 = vld [vmem:[#allocation13 + $0x50] ss:$8 sps:$4 sm:$0xff]  }
 0x620   : > { %v1395_v56 = vpop.xlane.xlu1 %1394 }
 0x621   : > { %v1397_v57 = vsub.f32 %v1383_v45, %v1395_v56  ;;  %v2785_v45 = vld [vmem:[#allocation13 + $0x70] ss:$8 sps:$4 sm:$0xff]   ;;  %v2796_v56 = vld [vmem:[#allocation13 + $0x44] ss:$8 sps:$4 sm:$0xff]  }
 0x623   : > { %v1400_v58 = vmul.f32 1.442695, %v1397_v57  ;;  %v2799_v57 = vld [vmem:[#allocation13 + $0x34] ss:$8 sps:$4 sm:$0xff]  }
 0x625   : > { %2829 = vpow2.f32 %v1400_v58  ;;  %v2797_v58 = vld [vmem:[#allocation13 + $0x30] ss:$8 sps:$4 sm:$0xff]  }
 0x632   : > { %v2830_v61 = vpop.eup %2829 }
 0x633   : > { %v1405_v62 = vsel %vm1389_vm7, %v2830_v61, 0.0 }
 0x634   : > { %1406 = vadd.xlane.f32.xlu0 %v1405_v62  ;;  %v2800_v62 = vld [vmem:[#allocation13 + $0x20] ss:$8 sps:$4 sm:$0xff]  }
 0x64a   : > { %1291 = vrot.lane.b32.xlu0 %v1273_v30, %s3150_s12  ;;  %v1404_v63 = vpop.xlane.xlu0 %1403 }
 0x64b   : > { %2831 = vrcp.f32 %v1404_v63  ;;  %v2805_v63 = vld [vmem:[#allocation13 + $0x14] ss:$8 sps:$4 sm:$0xff]  }
 0x658   : > { %v2832_v1 = vpop.eup %2831 }
 0x659   : > { %v1410_v4 = vmul.f32 %v2832_v1, %v2828_v54  ;;  %v2793_v54 = vld [vmem:[#allocation13 + $0x54] ss:$8 sps:$4 sm:$0xff]   ;;  %v2803_v1 = vld [vmem:[#allocation13 + $0x10] ss:$8 sps:$4 sm:$0xff]  }
 0x65b   : > { %v1412_v6 = vpack.c.bf16 %v1410_v4, %v1410_v4  ;;  %v2808_v4 = vld [vmem:[#allocation13 + $0x4] ss:$8 sps:$4 sm:$0xff]  }
 0x65d   : > { %2535 = vmatmul.mubr.msk.bf16.vlgmr.msra.gmra.mxu0 %vm1389_vm7, %v1412_v6  ;;  %v2809_v6 = vld [vmem:[#allocation14 + $0x78] sm:$0xff]  }
 0x65e   : > { %2545 = vmatpush3.bf16.msra.mxu0 %v2777_v5  ;;  %2552 = vmatprep.mubr.msk.bf16.mxu0 %vm3148_vm0, %v3147_v0  ;;  %v2806_v5 = vld [vmem:[#allocation13] ss:$8 sps:$4 sm:$0xff]  }
 0x65f   : > { %2546 = vmatprep.subr.bf16.mxu0 %v3147_v0 }
 0x662   : > { %2547 = vmatpush3.bf16.msra.mxu0 %v2778_v7  ;;  %v2810_v7 = vld [vmem:[#allocation14 + $0x38] sm:$0xff]  }
 0x663   : > { %2548 = vmatprep.subr.bf16.mxu0 %v3147_v0 }
 0x666   : > { %2549 = vmatpush3.bf16.msra.mxu0 %v2779_v8  ;;  %v2811_v8 = vld [vmem:[#allocation14 + $0x70] sm:$0xff]  }
 0x667   : > { %2550 = vmatprep.subr.bf16.mxu0 %v3147_v0 }
 0x66a   : > { %2551 = vmatpush3.bf16.msra.mxu0 %v2780_v10  ;;  %v2812_v10 = vld [vmem:[#allocation14 + $0x30] sm:$0xff]  }
 0x66b   : > { %1792 = vmatprep.subr.bf16.mxu0 %v2787_v46 }
 0x6bd   : > { %v1407_v11 = vpop.xlane.xlu0 %1406 }
 0x6be   : > { %2833 = vrcp.f32 %v1407_v11  ;;  %v2813_v11 = vld [vmem:[#allocation14 + $0x68] sm:$0xff]  }
 0x6c1   : > { %v1292_v12 = vpop.permute.xlu0 %1291 }
 0x6c2   : > { %v1295_v13 = vpack.c.bf16 %v1292_v12, %v1292_v12  ;;  %v2814_v12 = vld [vmem:[#allocation14 + $0x28] sm:$0xff]  }
 0x6c4   : > { %v1465_v14 = vsel %vm1417_vm6, %v1295_v13, 0  ;;  %v2815_v13 = vld [vmem:[#allocation14 + $0x60] sm:$0xff]  }
 0x6c5   : > { %2539 = vmatpush3.bf16.msra.mxu1 %v1465_v14  ;;  %v2816_v14 = vld [vmem:[#allocation14 + $0x20] sm:$0xff]  }
 0x6c6   : > { %2556 = vmatprep.subr.bf16.mxu1 %v3147_v0 }
 0x6cb   : > { %v2834_v15 = vpop.eup %2833 }
 0x6cc   : > { %v1411_v17 = vmul.f32 %v2834_v15, %v2830_v61  ;;  %v2802_v61 = vld [vmem:[#allocation13 + $0x24] ss:$8 sps:$4 sm:$0xff]   ;;  %v2817_v15 = vld [vmem:[#allocation14 + $0x58] sm:$0xff]  }
 0x6ce   : > { %v1413_v20 = vpack.c.bf16 %v1411_v17, %v1411_v17  ;;  %v2818_v17 = vld [vmem:[#allocation14 + $0x18] sm:$0xff]  }
 0x6d0   : > { %2541 = vmatmul.mubr.msk.bf16.vlgmr.msra.gmra.mxu1 %vm1389_vm7, %v1413_v20  ;;  %v2820_v20 = vld [vmem:[#allocation14 + $0x10] sm:$0xff]  }
 0x6d1   : > { %2557 = vmatpush3.bf16.msra.mxu1 %v2781_v18  ;;  %2564 = vmatprep.mubr.msk.bf16.mxu1 %vm3148_vm0, %v3147_v0  ;;  %v2819_v18 = vld [vmem:[#allocation14 + $0x50] sm:$0xff]  }
 0x6d2   : > { %2558 = vmatprep.subr.bf16.mxu1 %v3147_v0 }
 0x6d5   : > { %2559 = vmatpush3.bf16.msra.mxu1 %v2782_v21 }
 0x6d6   : > { %2560 = vmatprep.subr.bf16.mxu1 %v3147_v0 }
 0x6d9   : > { %2561 = vmatpush3.bf16.msra.mxu1 %v2783_v22 }
 0x6da   : > { %2562 = vmatprep.subr.bf16.mxu1 %v3147_v0 }
 0x6dd   : > { %2563 = vmatpush3.bf16.msra.mxu1 %v2784_v23 }
 0x6de   : > { %2438 = vmatprep.subr.bf16.mxu1 %v2809_v6 }
 0x71d   : > { %v1455_v24 = vpop.f32.mrf.mxu0 }
 0x71e   : > { %v1507_v25 = vpack.c.bf16 %v1455_v24, %v1455_v24  ;;  %v1679_v24 = vsub.s32 6, %v3407_v19 }
 0x71f   : > { %v2536_v26 = vpop.f32.mrf.mxu0 }
 0x720   : > { %2553 = vmatmul.mubr.msk.bf16.vlgmr.msra.gmra.mxu0 %vm1296_vm5, %v1507_v25  ;;  %v1684_v25 = vsub.s32 7, %v3407_v19  ;;  %v1680_v26 = vrot.slane %v3441_v60, %v1679_v24 }
 0x721   : > { %v1458_v27 = vpop.f32.mrf.mxu0  ;;  %1824 = vmatprep.mubr.bf16.mxu0 %v3149_v51  ;;  %1793 = vmatpush1.bf16.msra.mxu0 %v2785_v45 }
 0x722   : > { %1794 = vmatprep.subr.bf16.mxu0 %v2790_v47 }
 0x723   : > { %v2537_v28 = vpop.f32.mrf.mxu0 }
 0x725   : > { %1795 = vmatpush1.bf16.msra.mxu0 %v2788_v48 }
 0x726   : > { %1796 = vmatprep.subr.bf16.mxu0 %v2793_v54 }
 0x729   : > { %1797 = vmatpush1.bf16.msra.mxu0 %v2791_v55 }
 0x72a   : > { %1798 = vmatprep.subr.bf16.mxu0 %v2796_v56 }
 0x790   : > { %v1501_v29 = vpop.f32.mrf.mxu1 }
 0x791   : > { %v1508_v30 = vpack.c.bf16 %v1501_v29, %v1501_v29  ;;  %v1685_v29 = vrot.slane %v3441_v60, %v1684_v25 }
 0x792   : > { %v2542_v31 = vpop.f32.mrf.mxu1 }
 0x793   : > { %2565 = vmatmul.mubr.msk.bf16.vlgmr.msra.gmra.mxu1 %vm1296_vm5, %v1508_v30 }
 0x794   : > { %v1504_v32 = vpop.f32.mrf.mxu1  ;;  %2439 = vmatpush3.bf16.msra.mxu1 %v2810_v7 }
 0x795   : > { %2440 = vmatprep.subr.bf16.mxu1 %v2811_v8 }
 0x796   : > { %v2543_v33 = vpop.f32.mrf.mxu1 }
 0x797   : > { %v2821_v33 = vld [vmem:[#allocation14 + $0x48] sm:$0xff]  }
 0x798   : > { %2441 = vmatpush3.bf16.msra.mxu1 %v2812_v10 }
 0x799   : > { %2442 = vmatprep.subr.bf16.mxu1 %v2813_v11 }
 0x79c   : > { %2443 = vmatpush3.bf16.msra.mxu1 %v2814_v12 }
 0x79d   : > { %2444 = vmatprep.subr.bf16.mxu1 %v2815_v13 }
 0x7a0   : > { %2445 = vmatpush3.bf16.msra.mxu1 %v2816_v14 }
 0x7a1   : > { %2446 = vmatprep.subr.bf16.mxu1 %v2817_v15 }
 0x7a4   : > { %2447 = vmatpush3.bf16.msra.mxu1 %v2818_v17 }
 0x7a5   : > { %2448 = vmatprep.subr.bf16.mxu1 %v2819_v18 }
 0x7a8   : > { %2449 = vmatpush3.bf16.msra.mxu1 %v2820_v20 }
 0x7a9   : > { %2450 = vmatprep.subr.bf16.mxu1 %v2821_v33 }
 0x7e0   : > { %v1586_v34 = vpop.f32.mrf.mxu0 }
 0x7e2   : > { %v2554_v0 = vpop.f32.mrf.mxu0 }
 0x7e3   : > { %v2823_v0 = vld [vmem:[#allocation14 + $0x40] sm:$0xff]  }
 0x7e4   : > { %v1589_v35 = vpop.f32.mrf.mxu0 }
 0x7e5   : > { %v2824_v35 = vld [vmem:[#allocation14] sm:$0xff]  }
 0x7e6   : > { %v2555_v36 = vpop.f32.mrf.mxu0 }
 0x7e7   : > { %v427_v36 = vld [vmem:[#allocation5 + $0x18] sm:$0xff] }
 0x853   : > { %v1653_v39 = vpop.f32.mrf.mxu1 }
 0x854   : > { %v1659_v40 = vadd.f32 %v1653_v39, %v1586_v34  ;;  %v2822_v34 = vld [vmem:[#allocation14 + $0x8] sm:$0xff]   ;;  %v1711_v39 = vrot.slane %v428_v37, %v3439_v59 }
 0x855   : > { %v2566_v41 = vpop.f32.mrf.mxu1  ;;  %2451 = vmatpush3.bf16.msra.mxu1 %v2822_v34 }
 0x856   : > { %v1664_v51 = vadd.f32 %v1663_v38, %v1659_v40  ;;  %2452 = vmatprep.subr.bf16.mxu1 %v2823_v0  ;;  %v1707_v38 = vrot.slane %v427_v36, %v3439_v59 }
 0x857   : > { %v1656_v42 = vpop.f32.mrf.mxu1 }
 0x858   : > { %v1665_v43 = vadd.f32 %v1664_v51, %v3473_v9  ;;  %v2794_v9 = vld [vmem:[#allocation13 + $0x40] ss:$8 sps:$4 sm:$0xff]  }
 0x859   : > { %v2567_v44 = vpop.f32.mrf.mxu1  ;;  %1799 = vmatpush1.bf16.msra.mxu0 %v2794_v9  ;;  %2453 = vmatpush3.bf16.msra.mxu1 %v2824_v35 }
 0x85a   : > { %1666 = vadd.xlane.f32.xlu0 %v1665_v43  ;;  %1800 = vmatprep.subr.bf16.mxu0 %v2799_v57 }
 0x85d   : > { %1801 = vmatpush1.bf16.msra.mxu0 %v2797_v58 }
 0x85e   : > { %1802 = vmatprep.subr.bf16.mxu0 %v2802_v61 }
 0x861   : > { %1803 = vmatpush1.bf16.msra.mxu0 %v2800_v62 }
 0x862   : > { %1804 = vmatprep.subr.bf16.mxu0 %v2805_v63 }
 0x865   : > { %1805 = vmatpush1.bf16.msra.mxu0 %v2803_v1 }
 0x866   : > { %1806 = vmatprep.subr.bf16.mxu0 %v2808_v4  ;;  %v2029_v4 = vrot.slane %v427_v36, %v1021_v3 }
 0x869   : > { %1807 = vmatpush1.bf16.msra.mxu0 %v2806_v5 }
 0x8e3   : > { %v1667_v49 = vpop.xlane.xlu0 %1666 }
 0x8e4   : > { %v1668_v50 = vmul.f32 0.0078125, %v1667_v49  ;;  %v1872_v49 = vrot.slane %v427_v36, %v775_v16  ;;  %v2024_v16 = vrot.slane %v427_v36, %v1016_v2 }
 0x8e6   : > { %v1669_v52 = vsub.f32 %v1665_v43, %v1668_v50 }
 0x8e8   : > { %v1670_v53 = vmul.f32 %v1669_v52, %v1669_v52 }
 0x8ea   : > { %1671 = vadd.xlane.f32.xlu1 %v1670_v53 }
 0x973   : > { %v1672_v21 = vpop.xlane.xlu1 %1671 }
 0x974   : > { %v1673_v22 = vmul.f32 0.0078125, %v1672_v21 }
 0x976   : > { %v1674_v23 = vadd.f32 1e-05, %v1673_v22 }
 0x978   : > { %2835 = vrsqrt.f32 %v1674_v23 }
 0x985   : > { %v2836_v27 = vpop.eup %2835 }
 0x986   : > { %v1676_v28 = vmul.f32 %v2836_v27, %v1669_v52 }
 0x988   : > { %v1681_v30 = vmul.f32 %v1680_v26, %v1676_v28 }
 0x98a   : > { %v1686_v31 = vadd.f32 %v1685_v29, %v1681_v30 }
 0x98c   : > { %v1687_v32 = vpack.c.bf16 %v1686_v31, %v1686_v31 }
 0x98e   : > { %1825 = vmatmul.mubr.bf16.vlgmr.msra.gmra.mxu0 %v1687_v32 }
 0xa4e   : > { %v1826_v40 = vpop.f32.mrf.mxu0 }
 0xa4f   : > { %v1827_v60 = vadd.f32 %v1826_v40, %v1707_v38 }
 0xa50   : > { %v1828_v41 = vpop.f32.mrf.mxu0 }
 0xa51   : > { %v1829_v51 = vadd.f32 %v1828_v41, %v1711_v39  ;;  %v1833_v42 = vmax.f32 %v1827_v60, 0.0 }
 0xa52   : > { %v1830_v43 = vpop.f32.mrf.mxu0 }
 0xa53   : > { %v1834_v44 = vmax.f32 %v1829_v51, 0.0  ;;  %v1835_v47 = vpack.c.bf16 %v1833_v42, %v1833_v42 }
 0xa54   : > { %v1831_v45 = vpop.f32.mrf.mxu0 }
 0xa55   : > { %v1836_v46 = vpack.c.bf16 %v1834_v44, %v1834_v44 }
 0xa57   : > { %2001 = vmatprep.mubr.bf16.mxu1 %v1836_v46 }
 0xa58   : > { %2002 = vmatmul.mubr.bf16.vlgmr.msra.gmra.mxu1 %v1835_v47 }
 0xb18   : > { %v2454_v48 = vpop.f32.mrf.mxu1 }
 0xb1a   : > { %v2455_v50 = vpop.f32.mrf.mxu1 }
 0xb1b   : > { %v2456_v52 = vadd.f32 %v2455_v50, %v2454_v48 }
 0xb1c   : > { %v2457_v53 = vpop.f32.mrf.mxu1 }
 0xb1d   : > { %v2004_v59 = vadd.f32 %v2456_v52, %v1872_v49 }
 0xb1e   : > { %v2458_v54 = vpop.f32.mrf.mxu1 }
 0xb1f   : > { %v2009_v55 = vadd.f32 %v2004_v59, %v1686_v31 }
 0xb21   : > { %2010 = vadd.xlane.f32.xlu1 %v2009_v55 }
 0xbaa   : > { %v2011_v9 = vpop.xlane.xlu1 %2010 }
 0xbab   : > { %v2012_v56 = vmul.f32 0.0078125, %v2011_v9 }
 0xbad   : > { %v2013_v57 = vsub.f32 %v2009_v55, %v2012_v56 }
 0xbaf   : > { %v2014_v58 = vmul.f32 %v2013_v57, %v2013_v57 }
 0xbb1   : > { %2015 = vadd.xlane.f32.xlu1 %v2014_v58 }
 0xc3a   : > { %v2016_v61 = vpop.xlane.xlu1 %2015 }
 0xc3b   : > { %v2017_v62 = vmul.f32 0.0078125, %v2016_v61 }
 0xc3d   : > { %v2018_v63 = vadd.f32 1e-05, %v2017_v62 }
 0xc3f   : > { %2837 = vrsqrt.f32 %v2018_v63 }
 0xc4c   : > { %v2838_v1 = vpop.eup %2837 }
 0xc4d   : > { %v2020_v5 = vmul.f32 %v2838_v1, %v2013_v57 }
 0xc4f   : > { %v2025_v6 = vmul.f32 %v2024_v16, %v2020_v5 }
 0xc51   : > { %v2030_v7 = vadd.f32 %v2029_v4, %v2025_v6 }
 0xc53   : > { %2031 = vst [vmem:[%s422_s14] sm:$0xff] %v2030_v7 }
 0xc54   : > { %3062 = shalt.err (!%p3059_p4)
}
 0xc55   : > { %s3063_s26 = scalar_lea.hbm %s2044_s22, 128  ;;  %s3067_s2 = scalar_lea.hbm %s3579_s8, 256 }
 0xc56   : > { %p3064_p8 = scmp.ne.s32.totalorder %s2044_s22, %s3063_s26  ;;  %p3068_p7 = scmp.lt.s32.totalorder %s2044_s22, %s3579_s8 }
 0xc57   : > { %p3069_p0 = scmp.lt.s32.totalorder %s3067_s2, %s3063_s26 }
 0xc58   : > { %p3065_p6 = pnand %p3064_p8, %p3611_p10 }
 0xc59   : > { %p3070_p5 = por %p3069_p0, %p3068_p7 }
 0xc5a   : > { %p3066_p11 = pneg %p3065_p6 }
 0xc5c   : > { %p3071_p9 = pnand %p3070_p5, %p3066_p11 }
 0xc5e   : > { %3074 = shalt.err (!%p3071_p9)
}
 0xc5f   : > { %2598 = dma.vmem_to_hbm [thread:$0]  (%p3611_p10), %s2047_s19, 128, %s2044_s22, %s2033_s9  }
 0xc60 PF: > { %s2058_s23 = sand.u32 1, %s3117_s27   ;;  %p3612_p12 = scmp.ne.s32.totalorder %s3595_s17, 0 }
 0xc61   : > { %p3613_p13 = scmp.ge.s32.totalorder %s3129_s30, 2  ;;  %s2059_s14 = scalar_lea.sflag [#allocation4], %s2058_s23 }
 0xc63   : > { %p2627_p2 = pnand %p3613_p13, %p3612_p12 }
 0xc65   : > { %p2628_p1 = pneg %p2627_p2 }
 0xc67   : > { %3112 = dma.done.wait (%p2628_p1), %s2059_s14, 128  }
 0xc68   : > { %3114 = vsyncadd (%p2628_p1), %s2059_s14, 4294967168  ;;  %p25_p3 = scmp.ge.s32.totalorder %s3315_s18, 4   ;;  %s3614_s27 = smov %s3121_s28 }
 0xc69   : > { %s3615_s28 = smov %s3125_s29  ;;  %s3616_s29 = smov %s3327_s21 }
 0xc6a   : > { %s3617_s30 = smov %s3315_s18  ;;  %27 = sbr.rel (!%p25_p3) target bundleno = 13 (0xd), region = 125 }
 0xc6f   :  { %2064 = vsyncpa [#allocation3], 1 }
 0xc70   :  { %2066 = vsyncpa [#allocation3 + $0x1], 1 }
 0xc71   :  { %2067 = vsyncpa [#allocation6], 1 }
 0xc72   :  { %2068 = vsyncpa [#allocation9], 1 }
 0xc73   :  { %2069 = vsyncpa [#allocation12], 1 }
 0xc74   :  { %2070 = vsyncpa [#allocation15], 1 }
 0xc75   :  { %2071 = vsyncpa [#allocation4], 1 }
 0xc76   :  { %2073 = vsyncpa [#allocation4 + $0x1], 1 }

</bundles_post_ra>
